<compile_context>
chip_gen: v7x
topology: tpu7x:2x2x1
jax: 0.10.0
libtpu: 0.0.40
codegen_flags: <defaults>
</compile_context>

<pallas_src>
import jax
import jax.numpy as jnp
from jax import lax
from jax.experimental import pallas as pl
from jax.experimental.pallas import tpu as pltpu

# Keep f32 matmuls exact both inside the kernel and in the reference.
jax.config.update("jax_default_matmul_precision", "highest")


def _logsumexp(x, axis):
    m = jnp.max(x, axis=axis, keepdims=True)
    return m + jnp.log(jnp.sum(jnp.exp(x - m), axis=axis, keepdims=True))


# ----------------------------------------------------------------------------
# Kernel: one head per grid step, all batches of that head inside the step.
# ----------------------------------------------------------------------------
def _make_sortnet_kernel(*, b, t, buckets, bucket_size, max_buckets,
                         non_permutative, temperature, sinkhorn_iter, topk):
    """Block shapes seen by the kernel:
         qk_ref : (b, t, 2d)          q and k concatenated on the feature axis
         w_ref  : (2d, max_buckets)   this head's projection
         g_ref  : (b, buckets, max_buckets)   (sinkhorn path only)
         o_ref  : (b, buckets, out_cols)
    """

    def kernel(qk_ref, w_ref, *rest):
        if non_permutative:
            (o_ref,) = rest
            g_ref = None
        else:
            g_ref, o_ref = rest

        w = w_ref[...]

        # Pooling matrix P[(buckets, t)] : P[i, j] = 1 iff token j is in bucket i.
        # Hoisted out of the per-batch loop; the bucket sum becomes one MXU matmul.
        row = lax.broadcasted_iota(jnp.int32, (buckets, t), 0)
        col = lax.broadcasted_iota(jnp.int32, (buckets, t), 1)
        in_bucket = (col >= row * bucket_size) & (col < (row + 1) * bucket_size)

        lane = lax.broadcasted_iota(jnp.int32, (buckets, max_buckets), 1)

        for ib in range(b):  # b is small & static -> unrolled at trace time
            qk = qk_ref[ib]                                          # (t, 2d)
            pool = jnp.where(in_bucket, 1.0, 0.0).astype(qk.dtype)   # (buckets, t)

            # bucket sums of [q | k], then the head projection; f32 accumulation.
            x = jnp.dot(pool, qk, preferred_element_type=jnp.float32)        # (buckets, 2d)
            r = jnp.dot(x.astype(w.dtype), w, preferred_element_type=jnp.float32)
            r = jnp.maximum(r, 0.0)                # ReLU, (buckets, max_buckets) f32

            if non_permutative:
                # differentiable_topk (topk static, unrolled)
                pieces = []
                xk = r
                for i in range(topk):
                    z = xk / temperature
                    z = z - jnp.max(z, axis=-1, keepdims=True)
                    e = jnp.exp(z)
                    s = e / jnp.sum(e, axis=-1, keepdims=True)       # softmax
                    vmax = jnp.max(s, axis=-1, keepdims=True)
                    # first argmax (ties -> lowest index, matches torch.topk)
                    idx = jnp.min(jnp.where(s >= vmax, lane, max_buckets),
                                  axis=-1, keepdims=True)
                    mask = lane == idx
                    pieces.append(jnp.where(mask, vmax, 0.0))
                    if i != topk - 1:
                        xk = jnp.where(mask, -jnp.inf, xk)
                out = pieces[0] if topk == 1 else jnp.concatenate(pieces, axis=-1)
            else:
                # gumbel_sinkhorn (noise pre-sampled in the wrapper)
                rr = jnp.log(r + 1e-6)
                rr = (rr + g_ref[ib]) / temperature
                for _ in range(sinkhorn_iter):
                    rr = rr - _logsumexp(rr, axis=1)   # torch dim=2 (over max_buckets)
                    rr = rr - _logsumexp(rr, axis=0)   # torch dim=1 (over buckets)
                out = jnp.exp(rr)

            o_ref[ib] = out.astype(o_ref.dtype)

    return kernel


# ----------------------------------------------------------------------------
# Wrapper
# ----------------------------------------------------------------------------
def simple_sort_net_forward(q, k, linear, *, heads, bucket_size, max_buckets,
                            non_permutative, temperature, sinkhorn_iter,
                            topk=1, gumbel=None):
    """Pallas forward of SimpleSortNet.

    q, k   : (b*heads, t, d)
    linear : (1, heads, dim, max_buckets) with dim == 2*d
    gumbel : (b*heads, t//bucket_size, max_buckets) pre-sampled Gumbel noise
             (required for the sinkhorn path).
    """
    bh, t, d = q.shape
    assert bh % heads == 0
    b = bh // heads
    assert t % bucket_size == 0
    buckets = t // bucket_size
    dim = linear.shape[-2]
    assert dim == 2 * d, "linear dim must equal 2 * head_dim"

    # ---- layout plumbing (outside the kernel) ------------------------------
    # (bh, t, d) -> (heads, b, t, d): head-major so each grid step gets one
    # contiguous (b, t, 2d) slab plus exactly one head's weights.
    q4 = q.reshape(b, heads, t, d).transpose(1, 0, 2, 3)
    k4 = k.reshape(b, heads, t, d).transpose(1, 0, 2, 3)
    qk = jnp.concatenate([q4, k4], axis=-1)                  # (heads, b, t, 2d)
    w = linear.reshape(heads, dim, max_buckets)

    out_cols = topk * max_buckets if non_permutative else max_buckets

    kernel = _make_sortnet_kernel(
        b=b, t=t, buckets=buckets, bucket_size=bucket_size,
        max_buckets=max_buckets, non_permutative=non_permutative,
        temperature=temperature, sinkhorn_iter=sinkhorn_iter, topk=topk)

    in_specs = [
        pl.BlockSpec((None, b, t, dim), lambda h: (h, 0, 0, 0)),
        pl.BlockSpec((None, dim, max_buckets), lambda h: (h, 0, 0)),
    ]
    args = [qk, w]
    if not non_permutative:
        assert gumbel is not None, "sinkhorn path needs pre-sampled gumbel noise"
        g = gumbel.reshape(b, heads, buckets, max_buckets).transpose(1, 0, 2, 3)
        in_specs.append(pl.BlockSpec((None, b, buckets, max_buckets),
                                     lambda h: (h, 0, 0, 0)))
        args.append(g)

    out = pl.pallas_call(
        kernel,
        out_shape=jax.ShapeDtypeStruct((heads, b, buckets, out_cols), q.dtype),
        grid_spec=pltpu.PrefetchScalarGridSpec(
            num_scalar_prefetch=0,
            grid=(heads,),
            in_specs=in_specs,
            out_specs=pl.BlockSpec((None, b, buckets, out_cols),
                                   lambda h: (h, 0, 0, 0)),
        ),
        compiler_params=pltpu.CompilerParams(
            dimension_semantics=("parallel",),
        ),
    )(*args)

    # (heads, b, buckets, out_cols) -> (bh, buckets, out_cols)
    out = out.transpose(1, 0, 2, 3).reshape(bh, buckets, out_cols)
    if non_permutative:
        # torch: cat(dim=-1) then reshape(..., k * n, dim)
        out = out.reshape(bh, topk * buckets, max_buckets)
    return out


def sample_gumbel(key, shape, dtype=jnp.float32, eps=1e-6):
    u = jax.random.uniform(key, shape, dtype=dtype, minval=0.0, maxval=1.0)
    return -jnp.log(-jnp.log(u + eps) + eps)


# ----------------------------------------------------------------------------
# Pure-JAX reference (literal mirror of the PyTorch forward)
# ----------------------------------------------------------------------------
def simple_sort_net_reference(q, k, linear, *, heads, bucket_size, max_buckets,
                              non_permutative, temperature, sinkhorn_iter,
                              topk=1, gumbel=None):
    bh, t, d = q.shape
    b = bh // heads
    buckets = t // bucket_size
    dim = linear.shape[-2]

    b_q = q.reshape(bh, buckets, bucket_size, d).sum(axis=2)
    b_k = k.reshape(bh, buckets, bucket_size, d).sum(axis=2)
    x = jnp.concatenate([b_q, b_k], axis=-1)                  # (bh, buckets, 2d)

    w = jnp.broadcast_to(linear.reshape(1, heads, dim, max_buckets),
                         (b, heads, dim, max_buckets)).reshape(bh, dim, max_buckets)
    R = jax.nn.relu(jnp.einsum('bnd,bdm->bnm', x, w))

    if non_permutative:
        lead = R.shape[:-2]
        n, m = R.shape[-2:]
        xk = R
        pieces = []
        colv = jnp.arange(m)
        for i in range(topk):
            s = jax.nn.softmax(xk / temperature, axis=-1)
            vmax = jnp.max(s, axis=-1, keepdims=True)
            idx = jnp.min(jnp.where(s >= vmax, colv, m), axis=-1, keepdims=True)
            mask = colv == idx
            pieces.append(jnp.where(mask, vmax, 0.0))
            if i != topk - 1:
                xk = jnp.where(mask, -jnp.inf, xk)
        topks = jnp.concatenate(pieces, axis=-1)
        return topks.reshape(*lead, topk * n, m)
    else:
        r = jnp.log(R + 1e-6)
        r = (r + gumbel) / temperature
        for _ in range(sinkhorn_iter):
            r = r - jax.scipy.special.logsumexp(r, axis=2, keepdims=True)
            r = r - jax.scipy.special.logsumexp(r, axis=1, keepdims=True)
        return jnp.exp(r)


if __name__ == "__main__":
    # Small shapes consistent with SimpleSortNet usage.
    heads, bucket_size, max_buckets = 4, 4, 8
    b, t, d = 2, 32, 16                    # bh = 8, buckets = 8, dim = 32
    dim = 2 * d
    temperature, sinkhorn_iter = 0.7, 8
    bh = b * heads
    buckets = t // bucket_size

    key = jax.random.PRNGKey(0)
    kq, kk, kw, kg = jax.random.split(key, 4)
    q = jax.random.normal(kq, (bh, t, d), dtype=jnp.float32)
    k = jax.random.normal(kk, (bh, t, d), dtype=jnp.float32)
    linear = jax.random.normal(kw, (1, heads, dim, max_buckets), dtype=jnp.float32)
    gumbel = sample_gumbel(kg, (bh, buckets, max_buckets))

    common = dict(heads=heads, bucket_size=bucket_size, max_buckets=max_buckets,
                  temperature=temperature, sinkhorn_iter=sinkhorn_iter)

    # Path 1: gumbel-sinkhorn (non_permutative=False), noise pre-sampled.
    out_s = simple_sort_net_forward(q, k, linear, non_permutative=False,
                                    gumbel=gumbel, **common)
    out_s = jax.block_until_ready(out_s)
    ref_s = simple_sort_net_reference(q, k, linear, non_permutative=False,
                                      gumbel=gumbel, **common)
    assert out_s.shape == (bh, buckets, max_buckets)
    assert jnp.allclose(out_s, ref_s, atol=1e-4, rtol=1e-4), "sinkhorn path mismatch"

    # Path 2: differentiable top-k (non_permutative=True, topk=1).
    out_t = simple_sort_net_forward(q, k, linear, non_permutative=True,
                                    topk=1, **common)
    out_t = jax.block_until_ready(out_t)
    ref_t = simple_sort_net_reference(q, k, linear, non_permutative=True,
                                      topk=1, **common)
    assert out_t.shape == (bh, buckets, max_buckets)
    assert jnp.allclose(out_t, ref_t, atol=1e-4, rtol=1e-4), "topk path mismatch"

    print("KERNEL_OK")
</pallas_src>

<mosaic_0001>
module attributes {stable_mosaic.version = 11 : i64} {
  func.func @kernel(%arg0: i32, %arg1: memref<1x2x32x32xf32, #tpu.memory_space<vmem>>, %arg2: memref<1x32x8xf32, #tpu.memory_space<vmem>>, %arg3: memref<1x2x8x8xf32, #tpu.memory_space<vmem>>, %arg4: memref<1x2x8x8xf32, #tpu.memory_space<vmem>>) attributes {dimension_semantics = [#tpu.dimension_semantics<parallel>], iteration_bounds = array<i64: 4>, scalar_prefetch = 0 : i64, scratch_operands = 0 : i64, tpu.core_type = #tpu.core_type<tc>, window_params = [{transform_indices = @transform_0, window_bounds = array<i64: 1, 2, 32, 32>}, {transform_indices = @transform_1, window_bounds = array<i64: 1, 32, 8>}, {transform_indices = @transform_2, window_bounds = array<i64: 1, 2, 8, 8>}, {transform_indices = @transform_3, window_bounds = array<i64: 1, 2, 8, 8>}]} {
    %c0 = arith.constant 0 : index
    %c0_0 = arith.constant 0 : index
    %c0_1 = arith.constant 0 : index
    %0 = vector.load %arg2[%c0, %c0_0, %c0_1] : memref<1x32x8xf32, #tpu.memory_space<vmem>>, vector<1x32x8xf32>
    %1 = vector.shape_cast %0 : vector<1x32x8xf32> to vector<32x8xf32>
    %2 = tpu.iota {dimensions = array<i32: 0>} : vector<8x32xi32>
    %3 = tpu.iota {dimensions = array<i32: 1>} : vector<8x32xi32>
    %c4_i32 = arith.constant 4 : i32
    %4 = vector.broadcast %c4_i32 : i32 to vector<8x32xi32>
    %5 = arith.muli %2, %4 : vector<8x32xi32>
    %6 = arith.cmpi sge, %3, %5 : vector<8x32xi32>
    %c1_i32 = arith.constant 1 : i32
    %7 = vector.broadcast %c1_i32 : i32 to vector<8x32xi32>
    %8 = arith.addi %2, %7 : vector<8x32xi32>
    %c4_i32_2 = arith.constant 4 : i32
    %9 = vector.broadcast %c4_i32_2 : i32 to vector<8x32xi32>
    %10 = arith.muli %8, %9 : vector<8x32xi32>
    %11 = arith.cmpi slt, %3, %10 : vector<8x32xi32>
    %12 = arith.andi %6, %11 : vector<8x32xi1>
    %c0_3 = arith.constant 0 : index
    %c0_4 = arith.constant 0 : index
    %c0_5 = arith.constant 0 : index
    %c0_6 = arith.constant 0 : index
    %13 = vector.load %arg1[%c0_3, %c0_4, %c0_5, %c0_6] : memref<1x2x32x32xf32, #tpu.memory_space<vmem>>, vector<1x1x32x32xf32>
    %14 = vector.shape_cast %13 : vector<1x1x32x32xf32> to vector<32x32xf32>
    %cst = arith.constant 1.000000e+00 : f32
    %cst_7 = arith.constant 0.000000e+00 : f32
    %15 = vector.broadcast %cst : f32 to vector<8x32xf32>
    %16 = vector.broadcast %cst_7 : f32 to vector<8x32xf32>
    %17 = arith.select %12, %15, %16 : vector<8x32xi1>, vector<8x32xf32>
    %cst_8 = arith.constant dense<0.000000e+00> : vector<8x32xf32>
    %18 = tpu.matmul %17, %14, %cst_8 {dimension_numbers = #tpu.dot_dimension_numbers<[1], [0], [0], [1], [0, 0, 1, 1], [], []>, precision = #tpu.contract_precision<fp32>} : vector<8x32xf32>, vector<32x32xf32>, vector<8x32xf32> -> vector<8x32xf32>
    %cst_9 = arith.constant dense<0.000000e+00> : vector<8x8xf32>
    %19 = tpu.matmul %18, %1, %cst_9 {dimension_numbers = #tpu.dot_dimension_numbers<[1], [0], [0], [1], [0, 0, 1, 1], [], []>, precision = #tpu.contract_precision<fp32>} : vector<8x32xf32>, vector<32x8xf32>, vector<8x8xf32> -> vector<8x8xf32>
    %cst_10 = arith.constant 0.000000e+00 : f32
    %20 = vector.broadcast %cst_10 : f32 to vector<8x8xf32>
    %21 = arith.maximumf %19, %20 : vector<8x8xf32>
    %cst_11 = arith.constant 9.99999997E-7 : f32
    %22 = vector.broadcast %cst_11 : f32 to vector<8x8xf32>
    %23 = arith.addf %21, %22 : vector<8x8xf32>
    %24 = math.log %23 : vector<8x8xf32>
    %c0_12 = arith.constant 0 : index
    %c0_13 = arith.constant 0 : index
    %c0_14 = arith.constant 0 : index
    %c0_15 = arith.constant 0 : index
    %25 = vector.load %arg3[%c0_12, %c0_13, %c0_14, %c0_15] : memref<1x2x8x8xf32, #tpu.memory_space<vmem>>, vector<1x1x8x8xf32>
    %26 = vector.shape_cast %25 : vector<1x1x8x8xf32> to vector<8x8xf32>
    %27 = arith.addf %24, %26 : vector<8x8xf32>
    %cst_16 = arith.constant 0.699999988 : f32
    %28 = vector.broadcast %cst_16 : f32 to vector<8x8xf32>
    %29 = arith.divf %27, %28 : vector<8x8xf32>
    %cst_17 = arith.constant dense<0xFF800000> : vector<8xf32>
    %30 = vector.multi_reduction <maximumf>, %29, %cst_17 [1] : vector<8x8xf32> to vector<8xf32>
    %31 = vector.shape_cast %30 : vector<8xf32> to vector<8x1xf32>
    %32 = vector.broadcast %31 : vector<8x1xf32> to vector<8x8xf32>
    %33 = arith.subf %29, %32 : vector<8x8xf32>
    %34 = math.exp %33 : vector<8x8xf32>
    %cst_18 = arith.constant dense<0.000000e+00> : vector<8xf32>
    %35 = vector.multi_reduction <add>, %34, %cst_18 [1] : vector<8x8xf32> to vector<8xf32>
    %36 = vector.shape_cast %35 : vector<8xf32> to vector<8x1xf32>
    %37 = math.log %36 : vector<8x1xf32>
    %38 = arith.addf %31, %37 : vector<8x1xf32>
    %39 = vector.broadcast %38 : vector<8x1xf32> to vector<8x8xf32>
    %40 = arith.subf %29, %39 : vector<8x8xf32>
    %cst_19 = arith.constant dense<0xFF800000> : vector<8xf32>
    %41 = vector.multi_reduction <maximumf>, %40, %cst_19 [0] : vector<8x8xf32> to vector<8xf32>
    %42 = vector.shape_cast %41 : vector<8xf32> to vector<1x8xf32>
    %43 = vector.broadcast %42 : vector<1x8xf32> to vector<8x8xf32>
    %44 = arith.subf %40, %43 : vector<8x8xf32>
    %45 = math.exp %44 : vector<8x8xf32>
    %cst_20 = arith.constant dense<0.000000e+00> : vector<8xf32>
    %46 = vector.multi_reduction <add>, %45, %cst_20 [0] : vector<8x8xf32> to vector<8xf32>
    %47 = vector.shape_cast %46 : vector<8xf32> to vector<1x8xf32>
    %48 = math.log %47 : vector<1x8xf32>
    %49 = arith.addf %42, %48 : vector<1x8xf32>
    %50 = vector.broadcast %49 : vector<1x8xf32> to vector<8x8xf32>
    %51 = arith.subf %40, %50 : vector<8x8xf32>
    %cst_21 = arith.constant dense<0xFF800000> : vector<8xf32>
    %52 = vector.multi_reduction <maximumf>, %51, %cst_21 [1] : vector<8x8xf32> to vector<8xf32>
    %53 = vector.shape_cast %52 : vector<8xf32> to vector<8x1xf32>
    %54 = vector.broadcast %53 : vector<8x1xf32> to vector<8x8xf32>
    %55 = arith.subf %51, %54 : vector<8x8xf32>
    %56 = math.exp %55 : vector<8x8xf32>
    %cst_22 = arith.constant dense<0.000000e+00> : vector<8xf32>
    %57 = vector.multi_reduction <add>, %56, %cst_22 [1] : vector<8x8xf32> to vector<8xf32>
    %58 = vector.shape_cast %57 : vector<8xf32> to vector<8x1xf32>
    %59 = math.log %58 : vector<8x1xf32>
    %60 = arith.addf %53, %59 : vector<8x1xf32>
    %61 = vector.broadcast %60 : vector<8x1xf32> to vector<8x8xf32>
    %62 = arith.subf %51, %61 : vector<8x8xf32>
    %cst_23 = arith.constant dense<0xFF800000> : vector<8xf32>
    %63 = vector.multi_reduction <maximumf>, %62, %cst_23 [0] : vector<8x8xf32> to vector<8xf32>
    %64 = vector.shape_cast %63 : vector<8xf32> to vector<1x8xf32>
    %65 = vector.broadcast %64 : vector<1x8xf32> to vector<8x8xf32>
    %66 = arith.subf %62, %65 : vector<8x8xf32>
    %67 = math.exp %66 : vector<8x8xf32>
    %cst_24 = arith.constant dense<0.000000e+00> : vector<8xf32>
    %68 = vector.multi_reduction <add>, %67, %cst_24 [0] : vector<8x8xf32> to vector<8xf32>
    %69 = vector.shape_cast %68 : vector<8xf32> to vector<1x8xf32>
    %70 = math.log %69 : vector<1x8xf32>
    %71 = arith.addf %64, %70 : vector<1x8xf32>
    %72 = vector.broadcast %71 : vector<1x8xf32> to vector<8x8xf32>
    %73 = arith.subf %62, %72 : vector<8x8xf32>
    %cst_25 = arith.constant dense<0xFF800000> : vector<8xf32>
    %74 = vector.multi_reduction <maximumf>, %73, %cst_25 [1] : vector<8x8xf32> to vector<8xf32>
    %75 = vector.shape_cast %74 : vector<8xf32> to vector<8x1xf32>
    %76 = vector.broadcast %75 : vector<8x1xf32> to vector<8x8xf32>
    %77 = arith.subf %73, %76 : vector<8x8xf32>
    %78 = math.exp %77 : vector<8x8xf32>
    %cst_26 = arith.constant dense<0.000000e+00> : vector<8xf32>
    %79 = vector.multi_reduction <add>, %78, %cst_26 [1] : vector<8x8xf32> to vector<8xf32>
    %80 = vector.shape_cast %79 : vector<8xf32> to vector<8x1xf32>
    %81 = math.log %80 : vector<8x1xf32>
    %82 = arith.addf %75, %81 : vector<8x1xf32>
    %83 = vector.broadcast %82 : vector<8x1xf32> to vector<8x8xf32>
    %84 = arith.subf %73, %83 : vector<8x8xf32>
    %cst_27 = arith.constant dense<0xFF800000> : vector<8xf32>
    %85 = vector.multi_reduction <maximumf>, %84, %cst_27 [0] : vector<8x8xf32> to vector<8xf32>
    %86 = vector.shape_cast %85 : vector<8xf32> to vector<1x8xf32>
    %87 = vector.broadcast %86 : vector<1x8xf32> to vector<8x8xf32>
    %88 = arith.subf %84, %87 : vector<8x8xf32>
    %89 = math.exp %88 : vector<8x8xf32>
    %cst_28 = arith.constant dense<0.000000e+00> : vector<8xf32>
    %90 = vector.multi_reduction <add>, %89, %cst_28 [0] : vector<8x8xf32> to vector<8xf32>
    %91 = vector.shape_cast %90 : vector<8xf32> to vector<1x8xf32>
    %92 = math.log %91 : vector<1x8xf32>
    %93 = arith.addf %86, %92 : vector<1x8xf32>
    %94 = vector.broadcast %93 : vector<1x8xf32> to vector<8x8xf32>
    %95 = arith.subf %84, %94 : vector<8x8xf32>
    %cst_29 = arith.constant dense<0xFF800000> : vector<8xf32>
    %96 = vector.multi_reduction <maximumf>, %95, %cst_29 [1] : vector<8x8xf32> to vector<8xf32>
    %97 = vector.shape_cast %96 : vector<8xf32> to vector<8x1xf32>
    %98 = vector.broadcast %97 : vector<8x1xf32> to vector<8x8xf32>
    %99 = arith.subf %95, %98 : vector<8x8xf32>
    %100 = math.exp %99 : vector<8x8xf32>
    %cst_30 = arith.constant dense<0.000000e+00> : vector<8xf32>
    %101 = vector.multi_reduction <add>, %100, %cst_30 [1] : vector<8x8xf32> to vector<8xf32>
    %102 = vector.shape_cast %101 : vector<8xf32> to vector<8x1xf32>
    %103 = math.log %102 : vector<8x1xf32>
    %104 = arith.addf %97, %103 : vector<8x1xf32>
    %105 = vector.broadcast %104 : vector<8x1xf32> to vector<8x8xf32>
    %106 = arith.subf %95, %105 : vector<8x8xf32>
    %cst_31 = arith.constant dense<0xFF800000> : vector<8xf32>
    %107 = vector.multi_reduction <maximumf>, %106, %cst_31 [0] : vector<8x8xf32> to vector<8xf32>
    %108 = vector.shape_cast %107 : vector<8xf32> to vector<1x8xf32>
    %109 = vector.broadcast %108 : vector<1x8xf32> to vector<8x8xf32>
    %110 = arith.subf %106, %109 : vector<8x8xf32>
    %111 = math.exp %110 : vector<8x8xf32>
    %cst_32 = arith.constant dense<0.000000e+00> : vector<8xf32>
    %112 = vector.multi_reduction <add>, %111, %cst_32 [0] : vector<8x8xf32> to vector<8xf32>
    %113 = vector.shape_cast %112 : vector<8xf32> to vector<1x8xf32>
    %114 = math.log %113 : vector<1x8xf32>
    %115 = arith.addf %108, %114 : vector<1x8xf32>
    %116 = vector.broadcast %115 : vector<1x8xf32> to vector<8x8xf32>
    %117 = arith.subf %106, %116 : vector<8x8xf32>
    %cst_33 = arith.constant dense<0xFF800000> : vector<8xf32>
    %118 = vector.multi_reduction <maximumf>, %117, %cst_33 [1] : vector<8x8xf32> to vector<8xf32>
    %119 = vector.shape_cast %118 : vector<8xf32> to vector<8x1xf32>
    %120 = vector.broadcast %119 : vector<8x1xf32> to vector<8x8xf32>
    %121 = arith.subf %117, %120 : vector<8x8xf32>
    %122 = math.exp %121 : vector<8x8xf32>
    %cst_34 = arith.constant dense<0.000000e+00> : vector<8xf32>
    %123 = vector.multi_reduction <add>, %122, %cst_34 [1] : vector<8x8xf32> to vector<8xf32>
    %124 = vector.shape_cast %123 : vector<8xf32> to vector<8x1xf32>
    %125 = math.log %124 : vector<8x1xf32>
    %126 = arith.addf %119, %125 : vector<8x1xf32>
    %127 = vector.broadcast %126 : vector<8x1xf32> to vector<8x8xf32>
    %128 = arith.subf %117, %127 : vector<8x8xf32>
    %cst_35 = arith.constant dense<0xFF800000> : vector<8xf32>
    %129 = vector.multi_reduction <maximumf>, %128, %cst_35 [0] : vector<8x8xf32> to vector<8xf32>
    %130 = vector.shape_cast %129 : vector<8xf32> to vector<1x8xf32>
    %131 = vector.broadcast %130 : vector<1x8xf32> to vector<8x8xf32>
    %132 = arith.subf %128, %131 : vector<8x8xf32>
    %133 = math.exp %132 : vector<8x8xf32>
    %cst_36 = arith.constant dense<0.000000e+00> : vector<8xf32>
    %134 = vector.multi_reduction <add>, %133, %cst_36 [0] : vector<8x8xf32> to vector<8xf32>
    %135 = vector.shape_cast %134 : vector<8xf32> to vector<1x8xf32>
    %136 = math.log %135 : vector<1x8xf32>
    %137 = arith.addf %130, %136 : vector<1x8xf32>
    %138 = vector.broadcast %137 : vector<1x8xf32> to vector<8x8xf32>
    %139 = arith.subf %128, %138 : vector<8x8xf32>
    %cst_37 = arith.constant dense<0xFF800000> : vector<8xf32>
    %140 = vector.multi_reduction <maximumf>, %139, %cst_37 [1] : vector<8x8xf32> to vector<8xf32>
    %141 = vector.shape_cast %140 : vector<8xf32> to vector<8x1xf32>
    %142 = vector.broadcast %141 : vector<8x1xf32> to vector<8x8xf32>
    %143 = arith.subf %139, %142 : vector<8x8xf32>
    %144 = math.exp %143 : vector<8x8xf32>
    %cst_38 = arith.constant dense<0.000000e+00> : vector<8xf32>
    %145 = vector.multi_reduction <add>, %144, %cst_38 [1] : vector<8x8xf32> to vector<8xf32>
    %146 = vector.shape_cast %145 : vector<8xf32> to vector<8x1xf32>
    %147 = math.log %146 : vector<8x1xf32>
    %148 = arith.addf %141, %147 : vector<8x1xf32>
    %149 = vector.broadcast %148 : vector<8x1xf32> to vector<8x8xf32>
    %150 = arith.subf %139, %149 : vector<8x8xf32>
    %cst_39 = arith.constant dense<0xFF800000> : vector<8xf32>
    %151 = vector.multi_reduction <maximumf>, %150, %cst_39 [0] : vector<8x8xf32> to vector<8xf32>
    %152 = vector.shape_cast %151 : vector<8xf32> to vector<1x8xf32>
    %153 = vector.broadcast %152 : vector<1x8xf32> to vector<8x8xf32>
    %154 = arith.subf %150, %153 : vector<8x8xf32>
    %155 = math.exp %154 : vector<8x8xf32>
    %cst_40 = arith.constant dense<0.000000e+00> : vector<8xf32>
    %156 = vector.multi_reduction <add>, %155, %cst_40 [0] : vector<8x8xf32> to vector<8xf32>
    %157 = vector.shape_cast %156 : vector<8xf32> to vector<1x8xf32>
    %158 = math.log %157 : vector<1x8xf32>
    %159 = arith.addf %152, %158 : vector<1x8xf32>
    %160 = vector.broadcast %159 : vector<1x8xf32> to vector<8x8xf32>
    %161 = arith.subf %150, %160 : vector<8x8xf32>
    %cst_41 = arith.constant dense<0xFF800000> : vector<8xf32>
    %162 = vector.multi_reduction <maximumf>, %161, %cst_41 [1] : vector<8x8xf32> to vector<8xf32>
    %163 = vector.shape_cast %162 : vector<8xf32> to vector<8x1xf32>
    %164 = vector.broadcast %163 : vector<8x1xf32> to vector<8x8xf32>
    %165 = arith.subf %161, %164 : vector<8x8xf32>
    %166 = math.exp %165 : vector<8x8xf32>
    %cst_42 = arith.constant dense<0.000000e+00> : vector<8xf32>
    %167 = vector.multi_reduction <add>, %166, %cst_42 [1] : vector<8x8xf32> to vector<8xf32>
    %168 = vector.shape_cast %167 : vector<8xf32> to vector<8x1xf32>
    %169 = math.log %168 : vector<8x1xf32>
    %170 = arith.addf %163, %169 : vector<8x1xf32>
    %171 = vector.broadcast %170 : vector<8x1xf32> to vector<8x8xf32>
    %172 = arith.subf %161, %171 : vector<8x8xf32>
    %cst_43 = arith.constant dense<0xFF800000> : vector<8xf32>
    %173 = vector.multi_reduction <maximumf>, %172, %cst_43 [0] : vector<8x8xf32> to vector<8xf32>
    %174 = vector.shape_cast %173 : vector<8xf32> to vector<1x8xf32>
    %175 = vector.broadcast %174 : vector<1x8xf32> to vector<8x8xf32>
    %176 = arith.subf %172, %175 : vector<8x8xf32>
    %177 = math.exp %176 : vector<8x8xf32>
    %cst_44 = arith.constant dense<0.000000e+00> : vector<8xf32>
    %178 = vector.multi_reduction <add>, %177, %cst_44 [0] : vector<8x8xf32> to vector<8xf32>
    %179 = vector.shape_cast %178 : vector<8xf32> to vector<1x8xf32>
    %180 = math.log %179 : vector<1x8xf32>
    %181 = arith.addf %174, %180 : vector<1x8xf32>
    %182 = vector.broadcast %181 : vector<1x8xf32> to vector<8x8xf32>
    %183 = arith.subf %172, %182 : vector<8x8xf32>
    %cst_45 = arith.constant dense<0xFF800000> : vector<8xf32>
    %184 = vector.multi_reduction <maximumf>, %183, %cst_45 [1] : vector<8x8xf32> to vector<8xf32>
    %185 = vector.shape_cast %184 : vector<8xf32> to vector<8x1xf32>
    %186 = vector.broadcast %185 : vector<8x1xf32> to vector<8x8xf32>
    %187 = arith.subf %183, %186 : vector<8x8xf32>
    %188 = math.exp %187 : vector<8x8xf32>
    %cst_46 = arith.constant dense<0.000000e+00> : vector<8xf32>
    %189 = vector.multi_reduction <add>, %188, %cst_46 [1] : vector<8x8xf32> to vector<8xf32>
    %190 = vector.shape_cast %189 : vector<8xf32> to vector<8x1xf32>
    %191 = math.log %190 : vector<8x1xf32>
    %192 = arith.addf %185, %191 : vector<8x1xf32>
    %193 = vector.broadcast %192 : vector<8x1xf32> to vector<8x8xf32>
    %194 = arith.subf %183, %193 : vector<8x8xf32>
    %cst_47 = arith.constant dense<0xFF800000> : vector<8xf32>
    %195 = vector.multi_reduction <maximumf>, %194, %cst_47 [0] : vector<8x8xf32> to vector<8xf32>
    %196 = vector.shape_cast %195 : vector<8xf32> to vector<1x8xf32>
    %197 = vector.broadcast %196 : vector<1x8xf32> to vector<8x8xf32>
    %198 = arith.subf %194, %197 : vector<8x8xf32>
    %199 = math.exp %198 : vector<8x8xf32>
    %cst_48 = arith.constant dense<0.000000e+00> : vector<8xf32>
    %200 = vector.multi_reduction <add>, %199, %cst_48 [0] : vector<8x8xf32> to vector<8xf32>
    %201 = vector.shape_cast %200 : vector<8xf32> to vector<1x8xf32>
    %202 = math.log %201 : vector<1x8xf32>
    %203 = arith.addf %196, %202 : vector<1x8xf32>
    %204 = vector.broadcast %203 : vector<1x8xf32> to vector<8x8xf32>
    %205 = arith.subf %194, %204 : vector<8x8xf32>
    %206 = math.exp %205 : vector<8x8xf32>
    %c0_49 = arith.constant 0 : index
    %c0_50 = arith.constant 0 : index
    %c0_51 = arith.constant 0 : index
    %c0_52 = arith.constant 0 : index
    %207 = vector.load %arg4[%c0_49, %c0_50, %c0_51, %c0_52] : memref<1x2x8x8xf32, #tpu.memory_space<vmem>>, vector<1x1x8x8xf32>
    %208 = vector.shape_cast %207 : vector<1x1x8x8xf32> to vector<8x8xf32>
    %209 = vector.shape_cast %206 : vector<8x8xf32> to vector<1x1x8x8xf32>
    tpu.vector_store %arg4[%c0_49, %c0_50, %c0_51, %c0_52], %209 {strides = array<i32>} : memref<1x2x8x8xf32, #tpu.memory_space<vmem>>, vector<1x1x8x8xf32>,
    %c0_53 = arith.constant 0 : index
    %c1 = arith.constant 1 : index
    %c0_54 = arith.constant 0 : index
    %c0_55 = arith.constant 0 : index
    %210 = vector.load %arg1[%c0_53, %c1, %c0_54, %c0_55] : memref<1x2x32x32xf32, #tpu.memory_space<vmem>>, vector<1x1x32x32xf32>
    %211 = vector.shape_cast %210 : vector<1x1x32x32xf32> to vector<32x32xf32>
    %cst_56 = arith.constant 1.000000e+00 : f32
    %cst_57 = arith.constant 0.000000e+00 : f32
    %212 = vector.broadcast %cst_56 : f32 to vector<8x32xf32>
    %213 = vector.broadcast %cst_57 : f32 to vector<8x32xf32>
    %214 = arith.select %12, %212, %213 : vector<8x32xi1>, vector<8x32xf32>
    %cst_58 = arith.constant dense<0.000000e+00> : vector<8x32xf32>
    %215 = tpu.matmul %214, %211, %cst_58 {dimension_numbers = #tpu.dot_dimension_numbers<[1], [0], [0], [1], [0, 0, 1, 1], [], []>, precision = #tpu.contract_precision<fp32>} : vector<8x32xf32>, vector<32x32xf32>, vector<8x32xf32> -> vector<8x32xf32>
    %cst_59 = arith.constant dense<0.000000e+00> : vector<8x8xf32>
    %216 = tpu.matmul %215, %1, %cst_59 {dimension_numbers = #tpu.dot_dimension_numbers<[1], [0], [0], [1], [0, 0, 1, 1], [], []>, precision = #tpu.contract_precision<fp32>} : vector<8x32xf32>, vector<32x8xf32>, vector<8x8xf32> -> vector<8x8xf32>
    %cst_60 = arith.constant 0.000000e+00 : f32
    %217 = vector.broadcast %cst_60 : f32 to vector<8x8xf32>
    %218 = arith.maximumf %216, %217 : vector<8x8xf32>
    %cst_61 = arith.constant 9.99999997E-7 : f32
    %219 = vector.broadcast %cst_61 : f32 to vector<8x8xf32>
    %220 = arith.addf %218, %219 : vector<8x8xf32>
    %221 = math.log %220 : vector<8x8xf32>
    %c0_62 = arith.constant 0 : index
    %c1_63 = arith.constant 1 : index
    %c0_64 = arith.constant 0 : index
    %c0_65 = arith.constant 0 : index
    %222 = vector.load %arg3[%c0_62, %c1_63, %c0_64, %c0_65] : memref<1x2x8x8xf32, #tpu.memory_space<vmem>>, vector<1x1x8x8xf32>
    %223 = vector.shape_cast %222 : vector<1x1x8x8xf32> to vector<8x8xf32>
    %224 = arith.addf %221, %223 : vector<8x8xf32>
    %cst_66 = arith.constant 0.699999988 : f32
    %225 = vector.broadcast %cst_66 : f32 to vector<8x8xf32>
    %226 = arith.divf %224, %225 : vector<8x8xf32>
    %cst_67 = arith.constant dense<0xFF800000> : vector<8xf32>
    %227 = vector.multi_reduction <maximumf>, %226, %cst_67 [1] : vector<8x8xf32> to vector<8xf32>
    %228 = vector.shape_cast %227 : vector<8xf32> to vector<8x1xf32>
    %229 = vector.broadcast %228 : vector<8x1xf32> to vector<8x8xf32>
    %230 = arith.subf %226, %229 : vector<8x8xf32>
    %231 = math.exp %230 : vector<8x8xf32>
    %cst_68 = arith.constant dense<0.000000e+00> : vector<8xf32>
    %232 = vector.multi_reduction <add>, %231, %cst_68 [1] : vector<8x8xf32> to vector<8xf32>
    %233 = vector.shape_cast %232 : vector<8xf32> to vector<8x1xf32>
    %234 = math.log %233 : vector<8x1xf32>
    %235 = arith.addf %228, %234 : vector<8x1xf32>
    %236 = vector.broadcast %235 : vector<8x1xf32> to vector<8x8xf32>
    %237 = arith.subf %226, %236 : vector<8x8xf32>
    %cst_69 = arith.constant dense<0xFF800000> : vector<8xf32>
    %238 = vector.multi_reduction <maximumf>, %237, %cst_69 [0] : vector<8x8xf32> to vector<8xf32>
    %239 = vector.shape_cast %238 : vector<8xf32> to vector<1x8xf32>
    %240 = vector.broadcast %239 : vector<1x8xf32> to vector<8x8xf32>
    %241 = arith.subf %237, %240 : vector<8x8xf32>
    %242 = math.exp %241 : vector<8x8xf32>
    %cst_70 = arith.constant dense<0.000000e+00> : vector<8xf32>
    %243 = vector.multi_reduction <add>, %242, %cst_70 [0] : vector<8x8xf32> to vector<8xf32>
    %244 = vector.shape_cast %243 : vector<8xf32> to vector<1x8xf32>
    %245 = math.log %244 : vector<1x8xf32>
    %246 = arith.addf %239, %245 : vector<1x8xf32>
    %247 = vector.broadcast %246 : vector<1x8xf32> to vector<8x8xf32>
    %248 = arith.subf %237, %247 : vector<8x8xf32>
    %cst_71 = arith.constant dense<0xFF800000> : vector<8xf32>
    %249 = vector.multi_reduction <maximumf>, %248, %cst_71 [1] : vector<8x8xf32> to vector<8xf32>
    %250 = vector.shape_cast %249 : vector<8xf32> to vector<8x1xf32>
    %251 = vector.broadcast %250 : vector<8x1xf32> to vector<8x8xf32>
    %252 = arith.subf %248, %251 : vector<8x8xf32>
    %253 = math.exp %252 : vector<8x8xf32>
    %cst_72 = arith.constant dense<0.000000e+00> : vector<8xf32>
    %254 = vector.multi_reduction <add>, %253, %cst_72 [1] : vector<8x8xf32> to vector<8xf32>
    %255 = vector.shape_cast %254 : vector<8xf32> to vector<8x1xf32>
    %256 = math.log %255 : vector<8x1xf32>
    %257 = arith.addf %250, %256 : vector<8x1xf32>
    %258 = vector.broadcast %257 : vector<8x1xf32> to vector<8x8xf32>
    %259 = arith.subf %248, %258 : vector<8x8xf32>
    %cst_73 = arith.constant dense<0xFF800000> : vector<8xf32>
    %260 = vector.multi_reduction <maximumf>, %259, %cst_73 [0] : vector<8x8xf32> to vector<8xf32>
    %261 = vector.shape_cast %260 : vector<8xf32> to vector<1x8xf32>
    %262 = vector.broadcast %261 : vector<1x8xf32> to vector<8x8xf32>
    %263 = arith.subf %259, %262 : vector<8x8xf32>
    %264 = math.exp %263 : vector<8x8xf32>
    %cst_74 = arith.constant dense<0.000000e+00> : vector<8xf32>
    %265 = vector.multi_reduction <add>, %264, %cst_74 [0] : vector<8x8xf32> to vector<8xf32>
    %266 = vector.shape_cast %265 : vector<8xf32> to vector<1x8xf32>
    %267 = math.log %266 : vector<1x8xf32>
    %268 = arith.addf %261, %267 : vector<1x8xf32>
    %269 = vector.broadcast %268 : vector<1x8xf32> to vector<8x8xf32>
    %270 = arith.subf %259, %269 : vector<8x8xf32>
    %cst_75 = arith.constant dense<0xFF800000> : vector<8xf32>
    %271 = vector.multi_reduction <maximumf>, %270, %cst_75 [1] : vector<8x8xf32> to vector<8xf32>
    %272 = vector.shape_cast %271 : vector<8xf32> to vector<8x1xf32>
    %273 = vector.broadcast %272 : vector<8x1xf32> to vector<8x8xf32>
    %274 = arith.subf %270, %273 : vector<8x8xf32>
    %275 = math.exp %274 : vector<8x8xf32>
    %cst_76 = arith.constant dense<0.000000e+00> : vector<8xf32>
    %276 = vector.multi_reduction <add>, %275, %cst_76 [1] : vector<8x8xf32> to vector<8xf32>
    %277 = vector.shape_cast %276 : vector<8xf32> to vector<8x1xf32>
    %278 = math.log %277 : vector<8x1xf32>
    %279 = arith.addf %272, %278 : vector<8x1xf32>
    %280 = vector.broadcast %279 : vector<8x1xf32> to vector<8x8xf32>
    %281 = arith.subf %270, %280 : vector<8x8xf32>
    %cst_77 = arith.constant dense<0xFF800000> : vector<8xf32>
    %282 = vector.multi_reduction <maximumf>, %281, %cst_77 [0] : vector<8x8xf32> to vector<8xf32>
    %283 = vector.shape_cast %282 : vector<8xf32> to vector<1x8xf32>
    %284 = vector.broadcast %283 : vector<1x8xf32> to vector<8x8xf32>
    %285 = arith.subf %281, %284 : vector<8x8xf32>
    %286 = math.exp %285 : vector<8x8xf32>
    %cst_78 = arith.constant dense<0.000000e+00> : vector<8xf32>
    %287 = vector.multi_reduction <add>, %286, %cst_78 [0] : vector<8x8xf32> to vector<8xf32>
    %288 = vector.shape_cast %287 : vector<8xf32> to vector<1x8xf32>
    %289 = math.log %288 : vector<1x8xf32>
    %290 = arith.addf %283, %289 : vector<1x8xf32>
    %291 = vector.broadcast %290 : vector<1x8xf32> to vector<8x8xf32>
    %292 = arith.subf %281, %291 : vector<8x8xf32>
    %cst_79 = arith.constant dense<0xFF800000> : vector<8xf32>
    %293 = vector.multi_reduction <maximumf>, %292, %cst_79 [1] : vector<8x8xf32> to vector<8xf32>
    %294 = vector.shape_cast %293 : vector<8xf32> to vector<8x1xf32>
    %295 = vector.broadcast %294 : vector<8x1xf32> to vector<8x8xf32>
    %296 = arith.subf %292, %295 : vector<8x8xf32>
    %297 = math.exp %296 : vector<8x8xf32>
    %cst_80 = arith.constant dense<0.000000e+00> : vector<8xf32>
    %298 = vector.multi_reduction <add>, %297, %cst_80 [1] : vector<8x8xf32> to vector<8xf32>
    %299 = vector.shape_cast %298 : vector<8xf32> to vector<8x1xf32>
    %300 = math.log %299 : vector<8x1xf32>
    %301 = arith.addf %294, %300 : vector<8x1xf32>
    %302 = vector.broadcast %301 : vector<8x1xf32> to vector<8x8xf32>
    %303 = arith.subf %292, %302 : vector<8x8xf32>
    %cst_81 = arith.constant dense<0xFF800000> : vector<8xf32>
    %304 = vector.multi_reduction <maximumf>, %303, %cst_81 [0] : vector<8x8xf32> to vector<8xf32>
    %305 = vector.shape_cast %304 : vector<8xf32> to vector<1x8xf32>
    %306 = vector.broadcast %305 : vector<1x8xf32> to vector<8x8xf32>
    %307 = arith.subf %303, %306 : vector<8x8xf32>
    %308 = math.exp %307 : vector<8x8xf32>
    %cst_82 = arith.constant dense<0.000000e+00> : vector<8xf32>
    %309 = vector.multi_reduction <add>, %308, %cst_82 [0] : vector<8x8xf32> to vector<8xf32>
    %310 = vector.shape_cast %309 : vector<8xf32> to vector<1x8xf32>
    %311 = math.log %310 : vector<1x8xf32>
    %312 = arith.addf %305, %311 : vector<1x8xf32>
    %313 = vector.broadcast %312 : vector<1x8xf32> to vector<8x8xf32>
    %314 = arith.subf %303, %313 : vector<8x8xf32>
    %cst_83 = arith.constant dense<0xFF800000> : vector<8xf32>
    %315 = vector.multi_reduction <maximumf>, %314, %cst_83 [1] : vector<8x8xf32> to vector<8xf32>
    %316 = vector.shape_cast %315 : vector<8xf32> to vector<8x1xf32>
    %317 = vector.broadcast %316 : vector<8x1xf32> to vector<8x8xf32>
    %318 = arith.subf %314, %317 : vector<8x8xf32>
    %319 = math.exp %318 : vector<8x8xf32>
    %cst_84 = arith.constant dense<0.000000e+00> : vector<8xf32>
    %320 = vector.multi_reduction <add>, %319, %cst_84 [1] : vector<8x8xf32> to vector<8xf32>
    %321 = vector.shape_cast %320 : vector<8xf32> to vector<8x1xf32>
    %322 = math.log %321 : vector<8x1xf32>
    %323 = arith.addf %316, %322 : vector<8x1xf32>
    %324 = vector.broadcast %323 : vector<8x1xf32> to vector<8x8xf32>
    %325 = arith.subf %314, %324 : vector<8x8xf32>
    %cst_85 = arith.constant dense<0xFF800000> : vector<8xf32>
    %326 = vector.multi_reduction <maximumf>, %325, %cst_85 [0] : vector<8x8xf32> to vector<8xf32>
    %327 = vector.shape_cast %326 : vector<8xf32> to vector<1x8xf32>
    %328 = vector.broadcast %327 : vector<1x8xf32> to vector<8x8xf32>
    %329 = arith.subf %325, %328 : vector<8x8xf32>
    %330 = math.exp %329 : vector<8x8xf32>
    %cst_86 = arith.constant dense<0.000000e+00> : vector<8xf32>
    %331 = vector.multi_reduction <add>, %330, %cst_86 [0] : vector<8x8xf32> to vector<8xf32>
    %332 = vector.shape_cast %331 : vector<8xf32> to vector<1x8xf32>
    %333 = math.log %332 : vector<1x8xf32>
    %334 = arith.addf %327, %333 : vector<1x8xf32>
    %335 = vector.broadcast %334 : vector<1x8xf32> to vector<8x8xf32>
    %336 = arith.subf %325, %335 : vector<8x8xf32>
    %cst_87 = arith.constant dense<0xFF800000> : vector<8xf32>
    %337 = vector.multi_reduction <maximumf>, %336, %cst_87 [1] : vector<8x8xf32> to vector<8xf32>
    %338 = vector.shape_cast %337 : vector<8xf32> to vector<8x1xf32>
    %339 = vector.broadcast %338 : vector<8x1xf32> to vector<8x8xf32>
    %340 = arith.subf %336, %339 : vector<8x8xf32>
    %341 = math.exp %340 : vector<8x8xf32>
    %cst_88 = arith.constant dense<0.000000e+00> : vector<8xf32>
    %342 = vector.multi_reduction <add>, %341, %cst_88 [1] : vector<8x8xf32> to vector<8xf32>
    %343 = vector.shape_cast %342 : vector<8xf32> to vector<8x1xf32>
    %344 = math.log %343 : vector<8x1xf32>
    %345 = arith.addf %338, %344 : vector<8x1xf32>
    %346 = vector.broadcast %345 : vector<8x1xf32> to vector<8x8xf32>
    %347 = arith.subf %336, %346 : vector<8x8xf32>
    %cst_89 = arith.constant dense<0xFF800000> : vector<8xf32>
    %348 = vector.multi_reduction <maximumf>, %347, %cst_89 [0] : vector<8x8xf32> to vector<8xf32>
    %349 = vector.shape_cast %348 : vector<8xf32> to vector<1x8xf32>
    %350 = vector.broadcast %349 : vector<1x8xf32> to vector<8x8xf32>
    %351 = arith.subf %347, %350 : vector<8x8xf32>
    %352 = math.exp %351 : vector<8x8xf32>
    %cst_90 = arith.constant dense<0.000000e+00> : vector<8xf32>
    %353 = vector.multi_reduction <add>, %352, %cst_90 [0] : vector<8x8xf32> to vector<8xf32>
    %354 = vector.shape_cast %353 : vector<8xf32> to vector<1x8xf32>
    %355 = math.log %354 : vector<1x8xf32>
    %356 = arith.addf %349, %355 : vector<1x8xf32>
    %357 = vector.broadcast %356 : vector<1x8xf32> to vector<8x8xf32>
    %358 = arith.subf %347, %357 : vector<8x8xf32>
    %cst_91 = arith.constant dense<0xFF800000> : vector<8xf32>
    %359 = vector.multi_reduction <maximumf>, %358, %cst_91 [1] : vector<8x8xf32> to vector<8xf32>
    %360 = vector.shape_cast %359 : vector<8xf32> to vector<8x1xf32>
    %361 = vector.broadcast %360 : vector<8x1xf32> to vector<8x8xf32>
    %362 = arith.subf %358, %361 : vector<8x8xf32>
    %363 = math.exp %362 : vector<8x8xf32>
    %cst_92 = arith.constant dense<0.000000e+00> : vector<8xf32>
    %364 = vector.multi_reduction <add>, %363, %cst_92 [1] : vector<8x8xf32> to vector<8xf32>
    %365 = vector.shape_cast %364 : vector<8xf32> to vector<8x1xf32>
    %366 = math.log %365 : vector<8x1xf32>
    %367 = arith.addf %360, %366 : vector<8x1xf32>
    %368 = vector.broadcast %367 : vector<8x1xf32> to vector<8x8xf32>
    %369 = arith.subf %358, %368 : vector<8x8xf32>
    %cst_93 = arith.constant dense<0xFF800000> : vector<8xf32>
    %370 = vector.multi_reduction <maximumf>, %369, %cst_93 [0] : vector<8x8xf32> to vector<8xf32>
    %371 = vector.shape_cast %370 : vector<8xf32> to vector<1x8xf32>
    %372 = vector.broadcast %371 : vector<1x8xf32> to vector<8x8xf32>
    %373 = arith.subf %369, %372 : vector<8x8xf32>
    %374 = math.exp %373 : vector<8x8xf32>
    %cst_94 = arith.constant dense<0.000000e+00> : vector<8xf32>
    %375 = vector.multi_reduction <add>, %374, %cst_94 [0] : vector<8x8xf32> to vector<8xf32>
    %376 = vector.shape_cast %375 : vector<8xf32> to vector<1x8xf32>
    %377 = math.log %376 : vector<1x8xf32>
    %378 = arith.addf %371, %377 : vector<1x8xf32>
    %379 = vector.broadcast %378 : vector<1x8xf32> to vector<8x8xf32>
    %380 = arith.subf %369, %379 : vector<8x8xf32>
    %cst_95 = arith.constant dense<0xFF800000> : vector<8xf32>
    %381 = vector.multi_reduction <maximumf>, %380, %cst_95 [1] : vector<8x8xf32> to vector<8xf32>
    %382 = vector.shape_cast %381 : vector<8xf32> to vector<8x1xf32>
    %383 = vector.broadcast %382 : vector<8x1xf32> to vector<8x8xf32>
    %384 = arith.subf %380, %383 : vector<8x8xf32>
    %385 = math.exp %384 : vector<8x8xf32>
    %cst_96 = arith.constant dense<0.000000e+00> : vector<8xf32>
    %386 = vector.multi_reduction <add>, %385, %cst_96 [1] : vector<8x8xf32> to vector<8xf32>
    %387 = vector.shape_cast %386 : vector<8xf32> to vector<8x1xf32>
    %388 = math.log %387 : vector<8x1xf32>
    %389 = arith.addf %382, %388 : vector<8x1xf32>
    %390 = vector.broadcast %389 : vector<8x1xf32> to vector<8x8xf32>
    %391 = arith.subf %380, %390 : vector<8x8xf32>
    %cst_97 = arith.constant dense<0xFF800000> : vector<8xf32>
    %392 = vector.multi_reduction <maximumf>, %391, %cst_97 [0] : vector<8x8xf32> to vector<8xf32>
    %393 = vector.shape_cast %392 : vector<8xf32> to vector<1x8xf32>
    %394 = vector.broadcast %393 : vector<1x8xf32> to vector<8x8xf32>
    %395 = arith.subf %391, %394 : vector<8x8xf32>
    %396 = math.exp %395 : vector<8x8xf32>
    %cst_98 = arith.constant dense<0.000000e+00> : vector<8xf32>
    %397 = vector.multi_reduction <add>, %396, %cst_98 [0] : vector<8x8xf32> to vector<8xf32>
    %398 = vector.shape_cast %397 : vector<8xf32> to vector<1x8xf32>
    %399 = math.log %398 : vector<1x8xf32>
    %400 = arith.addf %393, %399 : vector<1x8xf32>
    %401 = vector.broadcast %400 : vector<1x8xf32> to vector<8x8xf32>
    %402 = arith.subf %391, %401 : vector<8x8xf32>
    %403 = math.exp %402 : vector<8x8xf32>
    %c0_99 = arith.constant 0 : index
    %c1_100 = arith.constant 1 : index
    %c0_101 = arith.constant 0 : index
    %c0_102 = arith.constant 0 : index
    %404 = vector.load %arg4[%c0_99, %c1_100, %c0_101, %c0_102] : memref<1x2x8x8xf32, #tpu.memory_space<vmem>>, vector<1x1x8x8xf32>
    %405 = vector.shape_cast %404 : vector<1x1x8x8xf32> to vector<8x8xf32>
    %406 = vector.shape_cast %403 : vector<8x8xf32> to vector<1x1x8x8xf32>
    tpu.vector_store %arg4[%c0_99, %c1_100, %c0_101, %c0_102], %406 {strides = array<i32>} : memref<1x2x8x8xf32, #tpu.memory_space<vmem>>, vector<1x1x8x8xf32>,
    return
  }
  func.func @transform_0(%arg0: i32) -> (i32, i32, i32, i32) {
    %c0_i32 = arith.constant 0 : i32
    %c0_i32_0 = arith.constant 0 : i32
    %c0_i32_1 = arith.constant 0 : i32
    %c0_i32_2 = arith.constant 0 : i32
    return %arg0, %c0_i32, %c0_i32_0, %c0_i32_1 : i32, i32, i32, i32
  }
  func.func @transform_1(%arg0: i32) -> (i32, i32, i32) {
    %c0_i32 = arith.constant 0 : i32
    %c0_i32_0 = arith.constant 0 : i32
    %c0_i32_1 = arith.constant 0 : i32
    return %arg0, %c0_i32, %c0_i32_0 : i32, i32, i32
  }
  func.func @transform_2(%arg0: i32) -> (i32, i32, i32, i32) {
    %c0_i32 = arith.constant 0 : i32
    %c0_i32_0 = arith.constant 0 : i32
    %c0_i32_1 = arith.constant 0 : i32
    %c0_i32_2 = arith.constant 0 : i32
    return %arg0, %c0_i32, %c0_i32_0, %c0_i32_1 : i32, i32, i32, i32
  }
  func.func @transform_3(%arg0: i32) -> (i32, i32, i32, i32) {
    %c0_i32 = arith.constant 0 : i32
    %c0_i32_0 = arith.constant 0 : i32
    %c0_i32_1 = arith.constant 0 : i32
    %c0_i32_2 = arith.constant 0 : i32
    return %arg0, %c0_i32, %c0_i32_0, %c0_i32_1 : i32, i32, i32, i32
  }
}

</mosaic_0001>

<bundles_post_ra>
// kernel: tpu_custom_call.1
= control target key start
LH: loop header
LB: loop body
LE: loop exit
PB: predicated region body
PF: predicated region fallthrough
CT: control target
= control target key end

     0   :  { %8 = vsyncpa [#allocation3], 0  ;;  %s4223_s0 = inlined_call_operand.hbm [shape: f32[4,2,32,32], index: 0, kind: input, shape index: {}]   ;;  %s4224_s1 = inlined_call_operand.vmem [shape: f32[4,32,8], index: 1, kind: input, shape index: {}]   ;;  %s4225_s2 = inlined_call_operand.vmem [shape: f32[4,2,8,8], index: 2, kind: input, shape index: {}]   ;;  %s4226_s3 = inlined_call_operand.hbm [shape: f32[4,2,8,8], index: 3, kind: output, shape index: {}]  }
   0x1   :  { %10 = vsyncpa [#allocation3 + $0x1], 0 }
   0x2   :  { %11 = vsyncpa [#allocation4], 0 }
   0x3   :  { %13 = vsyncpa [#allocation4 + $0x1], 0  ;;  %s3800_s12 = smov 0   ;;  %s3802_s13 = smov 0  }
   0x4   :  { %s3804_s14 = smov 0   ;;  %s3806_s15 = smov 0  }
   0x5 LB: > { %s3821_s16 = sadd.s32 4294967295, %s3769_s15   ;;  %s2882_s17 = sadd.s32 4294967294, %s3769_s15   ;;  %s3769_s15 = sphi %s3806_s15, %s4240_s15   ;;  %s3765_s14 = sphi %s3804_s14, %s4239_s14   ;;  %s3761_s13 = sphi %s3802_s13, %s4238_s13   ;;  %s3757_s12 = sphi %s3800_s12, %s4237_s12  }
   0x6   : > { %s3825_s18 = sadd.s32 1, %s3769_s15   ;;  %s26_s19 = sadd.s32 1, %s3765_s14 }
   0x7   : > { %s23_s20 = ssub.s32 %s3769_s15, %s3825_s18  ;;  %p33_p0 = scmp.ne.s32.totalorder %s3765_s14, %s3761_s13 }
   0x8   : > { %p24_p1 = scmp.eq.s32.totalorder %s23_s20, 0  ;;  %p34_p2 = scmp.eq.s32.totalorder %s3769_s15, 0 }
   0x9   : > { %p39_p3 = scmp.ne.s32.totalorder %s3761_s13, %s3757_s12  ;;  %p40_p4 = scmp.eq.s32.totalorder %s3821_s16, 0 }
   0xa   : > { %s3837_s21 = scalar_select %p24_p1, %s3765_s14, %s26_s19  }
   0xb   : > { %p3839_p5 = por %p34_p2, %p33_p0  ;;  %p3843_p6 = por %p40_p4, %p39_p3 }
   0xc   : > { %p115_p7 = scmp.eq.s32.totalorder %s3821_s16, 3  ;;  %p121_p8 = scmp.eq.s32.totalorder %s2882_s17, 3 }
   0xd   : > { %p3496_p9 = scmp.lt.s32.totalorder %s3769_s15, 4  ;;  %s141_s26 = sand.u32 1, %s3765_s14  }
   0xe   : > { %p3849_p10 = por %p115_p7, %p33_p0  ;;  %p3853_p11 = por %p121_p8, %p39_p3 }
   0xf   : > { %s2912_s27 = sshll.u32 %s3769_s15, 10  ;;  %s2885_s28 = sshll.u32 %s141_s26, 6 }
  0x10   : > { %s4230_s24 = scalar_select %p3849_p10, 1, 0 }
  0x11   : > { %s4231_s25 = scalar_select %p3853_p11, 1, 0 }
  0x12   : > { %s3862_s4 = scalar_lea.hbm %s4223_s0, %s2912_s27  ;;  %s145_s5 = scalar_lea.vmem [#allocation2], %s2885_s28 }
  0x13   : > { %s152_s6 = sshll.u32 %s145_s5, 4  ;;  %p3866_p12 = pnand %p3496_p9, %p3839_p5  ;;  %s3870_s6 = int_to_ptr.vmem [resolvable:$true] %s152_s6 }
  0x14   : > { %s3872_s8 = scalar_lea.sflag [#allocation3], %s141_s26  ;;  %s3673_s9 = scalar_lea.hbm %s3862_s4, 1024 }
  0x15   : > { %p3674_p13 = scmp.ne.s32.totalorder %s3862_s4, %s3673_s9  ;;  %p3675_p0 = pneg %p3866_p12 }
  0x16   : > { %s3678_s17 = scalar_lea.hbm %s4223_s0, 4096  ;;  %p3679_p3 = scmp.lt.u32.totalorder %s3862_s4, %s4223_s0 }
  0x17   : > { %p3676_p1 = pnand %p3675_p0, %p3674_p13  ;;  %p3680_p4 = scmp.lt.u32.totalorder %s3678_s17, %s3673_s9 }
  0x18   : > { %p3682_p7 = scmp.lt.u32.totalorder %s3673_s9, %s3862_s4 }
  0x19   : > { %p3677_p2 = pneg %p3676_p1  ;;  %p3681_p5 = por %p3680_p4, %p3679_p3 }
  0x1b   : > { %p3683_p8 = por %p3682_p7, %p3681_p5 }
  0x1d   : > { %p3684_p9 = pnand %p3683_p8, %p3677_p2 }
  0x1f   : > { %3687 = shalt.err (!%p3684_p9)
}
  0x20   : > { %s3688_s22 = scalar_lea.vmem %s3870_s6, 1024  ;;  %s3771_s26 = smov [#allocation2]  }
  0x21   : > { %p3689_p13 = scmp.ne.s32.totalorder %s3870_s6, %s3688_s22  ;;  %s3693_s27 = sshll.u32 %s3771_s26, 4  ;;  %s3694_s27 = int_to_ptr.vmem [resolvable:$false] %s3693_s27 }
  0x22   : > { %s3695_s28 = scalar_lea.vmem %s3694_s27, 2048  ;;  %p3696_p10 = scmp.lt.s32.totalorder %s3870_s6, %s3694_s27 }
  0x23   : > { %p3691_p1 = pnand %p3689_p13, %p3675_p0  ;;  %p3697_p3 = scmp.lt.s32.totalorder %s3695_s28, %s3688_s22 }
  0x25   : > { %p3692_p11 = pneg %p3691_p1  ;;  %p3698_p4 = por %p3697_p3, %p3696_p10 }
  0x27   : > { %p3699_p5 = pnand %p3698_p4, %p3692_p11 }
  0x29   : > { %3702 = shalt.err (!%p3699_p5)
}
  0x2a   : > { %s3772_s29 = smov 128   ;;  %s3773_s30 = smov 8  }
  0x2b   : > { %3491 = dma.hbm_to_vmem [thread:$0]  (!%p3866_p12), %s3862_s4, 1024, %s3870_s6, %s3872_s8, %s3772_s29, %s3772_s29, %s3773_s30  }
  0x2c   : > { %p2888_p0 = scmp.ge.s32.totalorder %s3769_s15, 1  ;;  %p176_p2 = scmp.lt.s32.totalorder %s3769_s15, 5 }
  0x2e   : > { %p177_p7 = pnand %p2888_p0, %p176_p2 }
  0x2f   : > { %s3903_s5 = sand.u32 (!%p177_p7), 1, %s3761_s13  }
  0x30   : > { %180 = sbr.rel (%p177_p7) target bundleno = 3696 (0xe70), region = 32  ;;  %s2889_s9 = sshll.u32 (!%p177_p7), %s3903_s5, 6 }
  0x31   : > { %s183_s10 = scalar_lea.sflag (!%p177_p7), [#allocation3], %s3903_s5  ;;  %s3907_s11 = scalar_lea.vmem (!%p177_p7), [#allocation2], %s2889_s9 }
  0x37   : > { %3748 = dma.done.wait (%p3843_p6), %s183_s10, 1024  }
  0x38   : > { %3750 = vsyncadd (%p3843_p6), %s183_s10, 4294966272  ;;  %v233_v0 = vlaneseq  ;;  %v3774_v1 = vmov 0.0|0.0   ;;  %vm3775_vm0 = vmmov 0   ;;  %v3776_v2 = vmov 0.0   ;;  %v243_v9 = vld [vmem:[%s3907_s11] sm:$0xff]  ;;  %v244_v10 = vld [vmem:[%s3907_s11 + $0x8] sm:$0xff] }
  0x39   : > { %3300 = vmatprep.subr.bf16.mxu0 %v3774_v1  ;;  %3044 = vmatprep.mubr.msk.f32.mxu0 %vm3775_vm0, %v3776_v2  ;;  %v245_v11 = vld [vmem:[%s3907_s11 + $0x10] sm:$0xff]  ;;  %v253_v12 = vand.u32 4294901760, %v243_v9  ;;  %v256_v13 = vand.u32 4294901760, %v244_v10  ;;  %v246_v14 = vld [vmem:[%s3907_s11 + $0x18] sm:$0xff]  ;;  %vm248_vm4 = vcmask 261120   ;;  %v2898_v46 = vld [vmem:[%s3907_s11 + $0x20] sm:$0xff] }
  0x3a   : > { %v234_v3 = vshrl.u32 %v233_v0, 7  ;;  %v236_v4 = vand.u32 127, %v233_v0  ;;  %3336 = vmatprep.subr.bf16.mxu1 %v3774_v1  ;;  %3110 = vmatprep.mubr.msk.f32.mxu1 %vm3775_vm0, %v3776_v2  ;;  %v259_v15 = vand.u32 4294901760, %v245_v11  ;;  %v262_v16 = vand.u32 4294901760, %v246_v14  ;;  %v2899_v47 = vld [vmem:[%s3907_s11 + $0x28] sm:$0xff]  ;;  %v2900_v51 = vld [vmem:[%s3907_s11 + $0x30] sm:$0xff] }
  0x3b   : > { %v3929_v17 = vpack.c.bf16 %v256_v13, %v253_v12  ;;  %v333_v18 = vsub.f32 %v243_v9, %v253_v12  ;;  %v340_v19 = vsub.f32 %v244_v10, %v256_v13  ;;  %v1515_v49 = vand.u32 4294901760, %v2898_v46  ;;  %v2901_v52 = vld [vmem:[%s3907_s11 + $0x38] sm:$0xff]  ;;  %p219_p6 = scmp.lt.s32.totalorder %s3821_s16, 3  ;;  %s2890_s26 = sshll.u32 %s3903_s5, 4 }
  0x3c   : > { %v237_v5 = vmul.u32 4, %v234_v3  ;;  %v239_v6 = vadd.s32 1, %v234_v3  ;;  %v347_v20 = vsub.f32 %v245_v11, %v259_v15  ;;  %v3931_v21 = vpack.c.bf16 %v262_v16, %v259_v15  ;;  %s218_s27 = scalar_lea.vmem [#allocation5], %s2890_s26  ;;  %s2915_s28 = sshll.u32 %s3821_s16, 8 }
  0x3d   : > { %v354_v22 = vsub.f32 %v246_v14, %v262_v16  ;;  %3302 = vmatpush3.bf16.msra.mxu0 %v3929_v17  ;;  %v334_v25 = vand.u32 4294901760, %v333_v18  ;;  %v341_v26 = vand.u32 4294901760, %v340_v19  ;;  %v3313_v43 = vpack.c.bf16 %v340_v19, %v333_v18  ;;  %s4022_s23 = scalar_select %p219_p6, %s3821_s16, 3 }
  0x3e   : > { %vm3919_vm1 = vcmp.ge.s32.totalorder %v236_v4, %v237_v5  ;;  %v240_v8 = vmul.u32 4, %v239_v6  ;;  %v348_v27 = vand.u32 4294901760, %v347_v20  ;;  %3303 = vmatprep.subr.bf16.mxu0 %v3774_v1  ;;  %v1518_v50 = vand.u32 4294901760, %v2899_v47  ;;  %s2785_s29 = sshll.u32 %s218_s27, 4  ;;  %s4177_s10 = scalar_lea.hbm %s4226_s3, %s2915_s28  ;;  %s4179_s29 = int_to_ptr.vmem [resolvable:$true] %s2785_s29 }
  0x3f   : > { %v355_v29 = vand.u32 4294901760, %v354_v22  ;;  %v335_v30 = vsub.f32 %v333_v18, %v334_v25  ;;  %v342_v31 = vsub.f32 %v340_v19, %v341_v26  ;;  %v3316_v44 = vpack.c.bf16 %v354_v22, %v347_v20  ;;  %s2913_s4 = sshll.u32 %s4022_s23, 5  ;;  %s2914_s17 = sshll.u32 %s4022_s23, 4 }
  0x40   : > { %vm241_vm2 = vcmp.lt.s32.totalorder %v236_v4, %v240_v8  ;;  %v349_v32 = vsub.f32 %v347_v20, %v348_v27  ;;  %v3325_v45 = vpack.c.bf16 %v341_v26, %v334_v25  ;;  %v1595_v53 = vsub.f32 %v2898_v46, %v1515_v49  ;;  %s223_s8 = scalar_lea.vmem %s4224_s1, %s2913_s4  ;;  %s228_s22 = scalar_lea.vmem %s4225_s2, %s2914_s17 }
  0x41   : > { %vm242_vm3 = vmand %vm3919_vm1, %vm241_vm2  ;;  %v356_v34 = vsub.f32 %v354_v22, %v355_v29  ;;  %3305 = vmatpush3.bf16.msra.mxu0 %v3931_v21  ;;  %v336_v35 = vand.u32 4294901760, %v335_v30  ;;  %v343_v36 = vand.u32 4294901760, %v342_v31  ;;  %v3328_v48 = vpack.c.bf16 %v355_v29, %v348_v27  ;;  %v230_v18 = vld [vmem:[%s223_s8 + $0x8] sm:$0xff]  ;;  %v231_v25 = vld [vmem:[%s223_s8 + $0x10] sm:$0xff]  ;;  %s2772_s11 = scalar_lea.sflag [#allocation4], %s3903_s5  ;;  %s3703_s23 = scalar_lea.vmem %s4179_s29, 256 }
  0x42   : > { %v3934_v23 = vsel %vm242_vm3, 1.0, %v3776_v2  ;;  %3306 = vmatprep.subr.bf16.mxu0 %v3774_v1  ;;  %v350_v39 = vand.u32 4294901760, %v349_v32  ;;  %v1602_v54 = vsub.f32 %v2899_v47, %v1518_v50  ;;  %v1521_v55 = vand.u32 4294901760, %v2900_v51  ;;  %v232_v26 = vld [vmem:[%s223_s8 + $0x18] sm:$0xff]  ;;  %p3704_p10 = scmp.ne.s32.totalorder %s4179_s29, %s3703_s23  ;;  %p4235_p11 = scmp.ne.s32.totalorder %s4230_s24, 0 }
  0x43   : > { %v250_v24 = vsel %vm248_vm4, %v3934_v23, 0  ;;  %v3307_v38 = vpack.c.bf16 %v343_v36, %v336_v35  ;;  %v357_v40 = vand.u32 4294901760, %v356_v34  ;;  %v1524_v56 = vand.u32 4294901760, %v2901_v52  ;;  %s3777_s16 = smov [#allocation5]  }
  0x44   : > { %v3940_v28 = vsub.f32 %v250_v24, %v250_v24  ;;  %v1609_v57 = vsub.f32 %v2900_v51, %v1521_v55  ;;  %v1596_v59 = vand.u32 4294901760, %v1595_v53  ;;  %v1603_v60 = vand.u32 4294901760, %v1602_v54  ;;  %p3705_p12 = pnand %p3704_p10, %p4235_p11  ;;  %s3707_s4 = sshll.u32 %s3777_s16, 4  ;;  %s3708_s4 = int_to_ptr.vmem [resolvable:$false] %s3707_s4 }
  0x45   : > { %v3310_v42 = vpack.c.bf16 %v357_v40, %v350_v39  ;;  %v1616_v58 = vsub.f32 %v2901_v52, %v1524_v56  ;;  %v3373_v61 = vpack.c.bf16 %v1518_v50, %v1515_v49  ;;  %v3376_v4 = vpack.c.bf16 %v1524_v56, %v1521_v55  ;;  %s3709_s6 = scalar_lea.vmem %s3708_s4, 512  ;;  %p3710_p9 = scmp.lt.s32.totalorder %s4179_s29, %s3708_s4 }
  0x46   : > { %v3943_v33 = vand.u32 4294901760, %v3940_v28  ;;  %v1597_v62 = vsub.f32 %v1595_v53, %v1596_v59  ;;  %v1604_v63 = vsub.f32 %v1602_v54, %v1603_v60  ;;  %v1610_v0 = vand.u32 4294901760, %v1609_v57  ;;  %p3706_p8 = pneg %p3705_p12  ;;  %p3711_p13 = scmp.lt.s32.totalorder %s3709_s6, %s3703_s23 }
  0x47   : > { %v1617_v3 = vand.u32 4294901760, %v1616_v58  ;;  %v3385_v13 = vpack.c.bf16 %v1602_v54, %v1595_v53  ;;  %v3388_v14 = vpack.c.bf16 %v1616_v58, %v1609_v57  ;;  %v3397_v15 = vpack.c.bf16 %v1603_v60, %v1596_v59 }
  0x48   : > { %v324_v37 = vsub.f32 %v3940_v28, %v3943_v33  ;;  %v1598_v5 = vand.u32 4294901760, %v1597_v62  ;;  %v1605_v6 = vand.u32 4294901760, %v1604_v63  ;;  %v1611_v7 = vsub.f32 %v1609_v57, %v1610_v0  ;;  %p3712_p1 = por %p3711_p13, %p3710_p9 }
  0x49   : > { %v1618_v8 = vsub.f32 %v1616_v58, %v1617_v3  ;;  %v3400_v16 = vpack.c.bf16 %v1617_v3, %v1610_v0  ;;  %v744_v20 = vand.u32 4294901760, %v230_v18  ;;  %v750_v27 = vand.u32 4294901760, %v232_v26 }
  0x4a   : > { %v3949_v41 = vand.u32 4294901760, %v324_v37  ;;  %v3379_v9 = vpack.c.bf16 %v1605_v6, %v1598_v5  ;;  %v1612_v10 = vand.u32 4294901760, %v1611_v7  ;;  %vm1233_vm5 = vcmask 64512   ;;  %p3713_p3 = pnand %p3712_p1, %p3706_p8 }
  0x4b   : > { %v1619_v11 = vand.u32 4294901760, %v1618_v8  ;;  %v828_v24 = vsub.f32 %v230_v18, %v744_v20  ;;  %v842_v34 = vsub.f32 %v232_v26, %v750_v27  ;;  %v1229_v8 = vld [vmem:[%s228_s22] sm:$0xff] }
  0x4c   : > { %3045 = vmatmul.mubr.f32.vlgmr.msra.gmra.mrb[0].mxu0 %v3949_v41 }
  0x4d   : > { %3308 = vmatpush3.bf16.msra.mxu0 %v3307_v38  ;;  %3055 = vmatprep.mubr.msk.f32.mxu0 %vm3775_vm0, %v3776_v2  ;;  %v3382_v12 = vpack.c.bf16 %v1619_v11, %v1612_v10  ;;  %v829_v29 = vand.u32 4294901760, %v828_v24  ;;  %v843_v38 = vand.u32 4294901760, %v842_v34 }
  0x4e   : > { %3309 = vmatprep.subr.bf16.mxu0 %v3774_v1 }
  0x4f   : > { %v830_v32 = vsub.f32 %v828_v24, %v829_v29 }
  0x51   : > { %3311 = vmatpush3.bf16.msra.mxu0 %v3310_v42  ;;  %v831_v36 = vand.u32 4294901760, %v830_v32 }
  0x52   : > { %3312 = vmatprep.subr.bf16.mxu0 %v3774_v1 }
  0x54   : > { %3056 = vmatmul.mubr.msk.f32.vlgmr.msra.gmra.mrb[0].mxu0 %vm248_vm4, %v3934_v23 }
  0x55   : > { %3314 = vmatpush3.bf16.msra.mxu0 %v3313_v43  ;;  %3066 = vmatprep.mubr.msk.f32.mxu0 %vm3775_vm0, %v3776_v2 }
  0x56   : > { %3315 = vmatprep.subr.bf16.mxu0 %v3774_v1 }
  0x59   : > { %3317 = vmatpush3.bf16.msra.mxu0 %v3316_v44 }
  0x5a   : > { %3318 = vmatprep.subr.bf16.mxu0 %v3774_v1 }
  0x5c   : > { %3067 = vmatmul.mubr.f32.vlgmr.msra.gmra.mrb[0].mxu0 %v3940_v28 }
  0x5d   : > { %3320 = vmatpush3.bf16.msra.mxu0 %v3929_v17  ;;  %3077 = vmatprep.mubr.msk.f32.mxu0 %vm3775_vm0, %v3776_v2 }
  0x5e   : > { %3321 = vmatprep.subr.bf16.mxu0 %v3774_v1 }
  0x61   : > { %3323 = vmatpush3.bf16.msra.mxu0 %v3931_v21 }
  0x62   : > { %3324 = vmatprep.subr.bf16.mxu0 %v3774_v1 }
  0x64   : > { %3078 = vmatmul.mubr.f32.vlgmr.msra.gmra.mrb[0].mxu0 %v3943_v33 }
  0x65   : > { %3326 = vmatpush3.bf16.msra.mxu0 %v3325_v45  ;;  %3088 = vmatprep.mubr.msk.f32.mxu0 %vm3775_vm0, %v3776_v2 }
  0x66   : > { %3327 = vmatprep.subr.bf16.mxu0 %v3774_v1 }
  0x69   : > { %3329 = vmatpush3.bf16.msra.mxu0 %v3328_v48 }
  0x6a   : > { %3330 = vmatprep.subr.bf16.mxu0 %v3774_v1 }
  0x6c   : > { %3089 = vmatmul.mubr.msk.f32.vlgmr.msra.gmra.mrb[0].mxu0 %vm248_vm4, %v3934_v23 }
  0x6d   : > { %3332 = vmatpush3.bf16.msra.mxu0 %v3929_v17  ;;  %3099 = vmatprep.mubr.msk.f32.mxu0 %vm3775_vm0, %v3776_v2  ;;  %v229_v17 = vld [vmem:[%s223_s8] sm:$0xff] }
  0x6e   : > { %3333 = vmatprep.subr.bf16.mxu0 %v3774_v1  ;;  %v741_v19 = vand.u32 4294901760, %v229_v17 }
  0x70   : > { %v821_v22 = vsub.f32 %v229_v17, %v741_v19 }
  0x71   : > { %3335 = vmatpush3.bf16.msra.mxu0 %v3931_v21  ;;  %v4028_v21 = vpack.c.bf16 %v744_v20, %v741_v19 }
  0x72   : > { %3372 = vmatprep.subr.bf16.mxu0 %v3774_v1  ;;  %v3349_v45 = vpack.c.bf16 %v828_v24, %v821_v22 }
  0x73   : > { %3338 = vmatpush3.bf16.msra.mxu1 %v4028_v21 }
  0x74   : > { %3100 = vmatmul.mubr.msk.f32.vlgmr.msra.gmra.mrb[0].mxu0 %vm248_vm4, %v3934_v23  ;;  %3339 = vmatprep.subr.bf16.mxu1 %v3774_v1 }
  0x75   : > { %3374 = vmatpush3.bf16.msra.mxu0 %v3373_v61  ;;  %3176 = vmatprep.mubr.msk.f32.mxu0 %vm3775_vm0, %v3776_v2 }
  0x76   : > { %3375 = vmatprep.subr.bf16.mxu0 %v3774_v1 }
  0x79   : > { %3377 = vmatpush3.bf16.msra.mxu0 %v3376_v4 }
  0x7a   : > { %3378 = vmatprep.subr.bf16.mxu0 %v3774_v1 }
  0x7c   : > { %3177 = vmatmul.mubr.f32.vlgmr.msra.gmra.mrb[2].mxu0 %v3949_v41  ;;  %v844_v41 = vsub.f32 %v842_v34, %v843_v38 }
  0x7d   : > { %3380 = vmatpush3.bf16.msra.mxu0 %v3379_v9  ;;  %3187 = vmatprep.mubr.msk.f32.mxu0 %vm3775_vm0, %v3776_v2 }
  0x7e   : > { %3381 = vmatprep.subr.bf16.mxu0 %v3774_v1  ;;  %v845_v43 = vand.u32 4294901760, %v844_v41 }
  0x81   : > { %3383 = vmatpush3.bf16.msra.mxu0 %v3382_v12 }
  0x82   : > { %3384 = vmatprep.subr.bf16.mxu0 %v3774_v1 }
  0x84   : > { %3188 = vmatmul.mubr.msk.f32.vlgmr.msra.gmra.mrb[2].mxu0 %vm248_vm4, %v3934_v23 }
  0x85   : > { %3386 = vmatpush3.bf16.msra.mxu0 %v3385_v13  ;;  %3198 = vmatprep.mubr.msk.f32.mxu0 %vm3775_vm0, %v3776_v2 }
  0x86   : > { %3387 = vmatprep.subr.bf16.mxu0 %v3774_v1 }
  0x89   : > { %3389 = vmatpush3.bf16.msra.mxu0 %v3388_v14 }
  0x8a   : > { %3390 = vmatprep.subr.bf16.mxu0 %v3774_v1 }
  0x8c   : > { %3199 = vmatmul.mubr.f32.vlgmr.msra.gmra.mrb[2].mxu0 %v3940_v28  ;;  %v822_v28 = vand.u32 4294901760, %v821_v22 }
  0x8d   : > { %3392 = vmatpush3.bf16.msra.mxu0 %v3373_v61  ;;  %3209 = vmatprep.mubr.msk.f32.mxu0 %vm3775_vm0, %v3776_v2 }
  0x8e   : > { %3393 = vmatprep.subr.bf16.mxu0 %v3774_v1  ;;  %v823_v31 = vsub.f32 %v821_v22, %v822_v28  ;;  %v4038_v47 = vpack.c.bf16 %v829_v29, %v822_v28 }
  0x90   : > { %v824_v35 = vand.u32 4294901760, %v823_v31 }
  0x91   : > { %3395 = vmatpush3.bf16.msra.mxu0 %v3376_v4 }
  0x92   : > { %3396 = vmatprep.subr.bf16.mxu0 %v3774_v1  ;;  %v3343_v39 = vpack.c.bf16 %v831_v36, %v824_v35 }
  0x94   : > { %3210 = vmatmul.mubr.f32.vlgmr.msra.gmra.mrb[2].mxu0 %v3943_v33 }
  0x95   : > { %3398 = vmatpush3.bf16.msra.mxu0 %v3397_v15  ;;  %3220 = vmatprep.mubr.msk.f32.mxu0 %vm3775_vm0, %v3776_v2 }
  0x96   : > { %3399 = vmatprep.subr.bf16.mxu0 %v3774_v1 }
  0x99   : > { %3401 = vmatpush3.bf16.msra.mxu0 %v3400_v16  ;;  %v2905_v16 = vld [vmem:[%s228_s22 + $0x8] sm:$0xff] }
  0x9a   : > { %3402 = vmatprep.subr.bf16.mxu0 %v3774_v1 }
  0x9c   : > { %3221 = vmatmul.mubr.msk.f32.vlgmr.msra.gmra.mrb[2].mxu0 %vm248_vm4, %v3934_v23 }
  0x9d   : > { %3404 = vmatpush3.bf16.msra.mxu0 %v3373_v61  ;;  %3231 = vmatprep.mubr.msk.f32.mxu0 %vm3775_vm0, %v3776_v2 }
  0x9e   : > { %3405 = vmatprep.subr.bf16.mxu0 %v3774_v1 }
  0xa1   : > { %3407 = vmatpush3.bf16.msra.mxu0 %v3376_v4 }
  0xa4   : > { %3232 = vmatmul.mubr.msk.f32.vlgmr.msra.gmra.mrb[2].mxu0 %vm248_vm4, %v3934_v23  ;;  %v747_v23 = vand.u32 4294901760, %v231_v25 }
  0xa6   : > { %v4032_v30 = vpack.c.bf16 %v750_v27, %v747_v23  ;;  %v835_v33 = vsub.f32 %v231_v25, %v747_v23 }
  0xa8   : > { %3341 = vmatpush3.bf16.msra.mxu1 %v4032_v30  ;;  %v836_v37 = vand.u32 4294901760, %v835_v33  ;;  %v4036_v46 = vpack.c.bf16 %v842_v34, %v835_v33 }
  0xa9   : > { %3342 = vmatprep.subr.bf16.mxu1 %v3774_v1 }
  0xaa   : > { %v837_v40 = vsub.f32 %v835_v33, %v836_v37  ;;  %v4040_v48 = vpack.c.bf16 %v843_v38, %v836_v37 }
  0xac   : > { %v838_v42 = vand.u32 4294901760, %v837_v40 }
  0xae   : > { %v3346_v44 = vpack.c.bf16 %v845_v43, %v838_v42 }
 0x147   : > { %v733_v49 = vpop.f32.mrb[0].mxu0 }
 0x148   : > { %v738_v50 = vsel %vm248_vm4, %v733_v49, 0  ;;  %v3101_v51 = vpop.f32.mrb[1].mxu0 }
 0x149   : > { %v809_v52 = vand.u32 4294901760, %v738_v50 }
 0x14b   : > { %v810_v53 = vsub.f32 %v738_v50, %v809_v52 }
 0x14d   : > { %v811_v54 = vand.u32 4294901760, %v810_v53 }
 0x14f   : > { %v812_v55 = vsub.f32 %v810_v53, %v811_v54 }
 0x151   : > { %v813_v56 = vand.u32 4294901760, %v812_v55 }
 0x153   : > { %3111 = vmatmul.mubr.f32.vlgmr.msra.gmra.mrb[0].mxu1 %v813_v56 }
 0x154   : > { %3344 = vmatpush3.bf16.msra.mxu1 %v3343_v39  ;;  %3121 = vmatprep.mubr.msk.f32.mxu1 %vm3775_vm0, %v3776_v2 }
 0x155   : > { %3345 = vmatprep.subr.bf16.mxu1 %v3774_v1 }
 0x158   : > { %3347 = vmatpush3.bf16.msra.mxu1 %v3346_v44 }
 0x159   : > { %3348 = vmatprep.subr.bf16.mxu1 %v3774_v1 }
 0x15b   : > { %3122 = vmatmul.mubr.f32.vlgmr.msra.gmra.mrb[0].mxu1 %v809_v52 }
 0x15c   : > { %3350 = vmatpush3.bf16.msra.mxu1 %v3349_v45  ;;  %3132 = vmatprep.mubr.msk.f32.mxu1 %vm3775_vm0, %v3776_v2 }
 0x15d   : > { %3351 = vmatprep.subr.bf16.mxu1 %v3774_v1 }
 0x160   : > { %3353 = vmatpush3.bf16.msra.mxu1 %v4036_v46 }
 0x161   : > { %3354 = vmatprep.subr.bf16.mxu1 %v3774_v1 }
 0x163   : > { %3133 = vmatmul.mubr.f32.vlgmr.msra.gmra.mrb[0].mxu1 %v810_v53 }
 0x164   : > { %3356 = vmatpush3.bf16.msra.mxu1 %v4028_v21  ;;  %3143 = vmatprep.mubr.msk.f32.mxu1 %vm3775_vm0, %v3776_v2 }
 0x165   : > { %3357 = vmatprep.subr.bf16.mxu1 %v3774_v1 }
 0x168   : > { %3359 = vmatpush3.bf16.msra.mxu1 %v4032_v30 }
 0x169   : > { %3360 = vmatprep.subr.bf16.mxu1 %v3774_v1 }
 0x16b   : > { %3144 = vmatmul.mubr.f32.vlgmr.msra.gmra.mrb[0].mxu1 %v811_v54 }
 0x16c   : > { %3362 = vmatpush3.bf16.msra.mxu1 %v4038_v47  ;;  %3154 = vmatprep.mubr.msk.f32.mxu1 %vm3775_vm0, %v3776_v2 }
 0x16d   : > { %3363 = vmatprep.subr.bf16.mxu1 %v3774_v1 }
 0x170   : > { %3365 = vmatpush3.bf16.msra.mxu1 %v4040_v48 }
 0x171   : > { %3366 = vmatprep.subr.bf16.mxu1 %v3774_v1 }
 0x173   : > { %3155 = vmatmul.mubr.f32.vlgmr.msra.gmra.mrb[0].mxu1 %v809_v52 }
 0x174   : > { %3368 = vmatpush3.bf16.msra.mxu1 %v4028_v21  ;;  %3165 = vmatprep.mubr.msk.f32.mxu1 %vm3775_vm0, %v3776_v2 }
 0x175   : > { %3369 = vmatprep.subr.bf16.mxu1 %v3774_v1 }
 0x177   : > { %v1995_v57 = vpop.f32.mrb[2].mxu0 }
 0x178   : > { %v2000_v58 = vsel %vm248_vm4, %v1995_v57, 0  ;;  %3371 = vmatpush3.bf16.msra.mxu1 %v4032_v30  ;;  %v3233_v59 = vpop.f32.mrb[3].mxu0 }
 0x179   : > { %v2071_v60 = vand.u32 4294901760, %v2000_v58  ;;  %3408 = vmatprep.subr.bf16.mxu1 %v3774_v1 }
 0x17b   : > { %v2072_v61 = vsub.f32 %v2000_v58, %v2071_v60  ;;  %3166 = vmatmul.mubr.f32.vlgmr.msra.gmra.mrb[0].mxu1 %v809_v52 }
 0x17c   : > { %3410 = vmatpush3.bf16.msra.mxu1 %v4028_v21  ;;  %3242 = vmatprep.mubr.msk.f32.mxu1 %vm3775_vm0, %v3776_v2 }
 0x17d   : > { %v2073_v62 = vand.u32 4294901760, %v2072_v61  ;;  %3411 = vmatprep.subr.bf16.mxu1 %v3774_v1 }
 0x17f   : > { %v2074_v63 = vsub.f32 %v2072_v61, %v2073_v62 }
 0x180   : > { %3413 = vmatpush3.bf16.msra.mxu1 %v4032_v30 }
 0x181   : > { %v2075_v0 = vand.u32 4294901760, %v2074_v63  ;;  %3414 = vmatprep.subr.bf16.mxu1 %v3774_v1 }
 0x183   : > { %3243 = vmatmul.mubr.f32.vlgmr.msra.gmra.mrb[2].mxu1 %v2075_v0 }
 0x184   : > { %3416 = vmatpush3.bf16.msra.mxu1 %v3343_v39  ;;  %3253 = vmatprep.mubr.msk.f32.mxu1 %vm3775_vm0, %v3776_v2 }
 0x185   : > { %3417 = vmatprep.subr.bf16.mxu1 %v3774_v1 }
 0x188   : > { %3419 = vmatpush3.bf16.msra.mxu1 %v3346_v44 }
 0x189   : > { %3420 = vmatprep.subr.bf16.mxu1 %v3774_v1 }
 0x18b   : > { %3254 = vmatmul.mubr.f32.vlgmr.msra.gmra.mrb[2].mxu1 %v2071_v60 }
 0x18c   : > { %3422 = vmatpush3.bf16.msra.mxu1 %v3349_v45  ;;  %3264 = vmatprep.mubr.msk.f32.mxu1 %vm3775_vm0, %v3776_v2 }
 0x18d   : > { %3423 = vmatprep.subr.bf16.mxu1 %v3774_v1 }
 0x190   : > { %3425 = vmatpush3.bf16.msra.mxu1 %v4036_v46 }
 0x191   : > { %3426 = vmatprep.subr.bf16.mxu1 %v3774_v1 }
 0x193   : > { %3265 = vmatmul.mubr.f32.vlgmr.msra.gmra.mrb[2].mxu1 %v2072_v61 }
 0x194   : > { %3428 = vmatpush3.bf16.msra.mxu1 %v4028_v21  ;;  %3275 = vmatprep.mubr.msk.f32.mxu1 %vm3775_vm0, %v3776_v2 }
 0x195   : > { %3429 = vmatprep.subr.bf16.mxu1 %v3774_v1 }
 0x198   : > { %3431 = vmatpush3.bf16.msra.mxu1 %v4032_v30 }
 0x199   : > { %3432 = vmatprep.subr.bf16.mxu1 %v3774_v1 }
 0x19b   : > { %3276 = vmatmul.mubr.f32.vlgmr.msra.gmra.mrb[2].mxu1 %v2073_v62 }
 0x19c   : > { %3434 = vmatpush3.bf16.msra.mxu1 %v4038_v47  ;;  %3286 = vmatprep.mubr.msk.f32.mxu1 %vm3775_vm0, %v3776_v2 }
 0x19d   : > { %3435 = vmatprep.subr.bf16.mxu1 %v3774_v1 }
 0x1a0   : > { %3437 = vmatpush3.bf16.msra.mxu1 %v4040_v48 }
 0x1a1   : > { %3438 = vmatprep.subr.bf16.mxu1 %v3774_v1 }
 0x1a3   : > { %3287 = vmatmul.mubr.f32.vlgmr.msra.gmra.mrb[2].mxu1 %v2071_v60 }
 0x1a4   : > { %3440 = vmatpush3.bf16.msra.mxu1 %v4028_v21  ;;  %3297 = vmatprep.mubr.msk.f32.mxu1 %vm3775_vm0, %v3776_v2 }
 0x1a5   : > { %3441 = vmatprep.subr.bf16.mxu1 %v3774_v1 }
 0x1a8   : > { %3443 = vmatpush3.bf16.msra.mxu1 %v4032_v30 }
 0x1ab   : > { %3298 = vmatmul.mubr.f32.vlgmr.msra.gmra.mrb[2].mxu1 %v2071_v60 }
 0x24e   : > { %v1221_v3 = vpop.f32.mrb[0].mxu1 }
 0x24f   : > { %v1225_v4 = vmax.f32 %v1221_v3, 0.0  ;;  %v3167_v5 = vpop.f32.mrb[1].mxu1 }
 0x251   : > { %v1226_v6 = vadd.f32 1e-06, %v1225_v4 }
 0x253   : > { %3537 = vlog2.f32 %v1226_v6 }
 0x25d   : > { %v3538_v7 = vpop.eup %3537 }
 0x25e   : > { %v1228_v9 = vmul.f32 0.6931472, %v3538_v7 }
 0x260   : > { %v1230_v10 = vadd.f32 %v1229_v8, %v1228_v9 }
 0x262   : > { %v1232_v2 = vmul.f32 1.4285715, %v1230_v10 }
 0x264   : > { %v1234_v1 = vsel %vm1233_vm5, %v1232_v2, -inf }
 0x265   : > { %1235 = vmax.xlane.f32.xlu0 %v1234_v1 }
 0x27e   : > { %v2483_v11 = vpop.f32.mrb[2].mxu1 }
 0x27f   : > { %v2487_v12 = vmax.f32 %v2483_v11, 0.0  ;;  %v3299_v13 = vpop.f32.mrb[3].mxu1 }
 0x281   : > { %v2488_v14 = vadd.f32 1e-06, %v2487_v12 }
 0x283   : > { %3539 = vlog2.f32 %v2488_v14 }
 0x28d   : > { %v3540_v15 = vpop.eup %3539 }
 0x28e   : > { %v2490_v17 = vmul.f32 0.6931472, %v3540_v15 }
 0x290   : > { %v2493_v18 = vadd.f32 %v2905_v16, %v2490_v17 }
 0x292   : > { %v2494_v19 = vmul.f32 1.4285715, %v2493_v18 }
 0x294   : > { %v2495_v20 = vsel %vm1233_vm5, %v2494_v19, -inf }
 0x295   : > { %2496 = vmax.xlane.f32.xlu0 %v2495_v20 }
 0x2f2   : > { %v1236_v21 = vpop.xlane.xlu0 %1235 }
 0x2f3   : > { %v1237_v22 = vsub.f32 %v1232_v2, %v1236_v21 }
 0x2f5   : > { %v1238_v24 = vmul.f32 1.442695, %v1237_v22 }
 0x2f7   : > { %3541 = vpow2.f32 %v1238_v24 }
 0x301   : > { %v3542_v25 = vpop.eup %3541 }
 0x302   : > { %v1240_v26 = vsel %vm1233_vm5, %v3542_v25, 0.0 }
 0x303   : > { %1241 = vadd.xlane.f32.xlu1 %v1240_v26 }
 0x322   : > { %v2497_v23 = vpop.xlane.xlu0 %2496 }
 0x323   : > { %v2498_v27 = vsub.f32 %v2494_v19, %v2497_v23 }
 0x325   : > { %v2499_v28 = vmul.f32 1.442695, %v2498_v27 }
 0x327   : > { %3543 = vpow2.f32 %v2499_v28 }
 0x331   : > { %v3544_v29 = vpop.eup %3543 }
 0x332   : > { %v2501_v30 = vsel %vm1233_vm5, %v3544_v29, 0.0 }
 0x333   : > { %2502 = vadd.xlane.f32.xlu1 %v2501_v30 }
 0x390   : > { %v1242_v31 = vpop.xlane.xlu1 %1241 }
 0x391   : > { %3545 = vlog2.f32 %v1242_v31 }
 0x39b   : > { %v3546_v32 = vpop.eup %3545 }
 0x39c   : > { %v1244_v33 = vmul.f32 0.6931472, %v3546_v32 }
 0x39e   : > { %v1245_v34 = vadd.f32 %v1244_v33, %v1236_v21 }
 0x3a0   : > { %v1246_v35 = vsub.f32 %v1232_v2, %v1245_v34 }
 0x3a2   : > { %v1247_v36 = vsel %vm1233_vm5, %v1246_v35, -inf }
 0x3a3   : > { %v1248_v37 = vrot.slane %v1247_v36, 4 }
 0x3a5   : > { %v1249_v38 = vmax.f32 %v1247_v36, %v1248_v37 }
 0x3a7   : > { %v1250_v39 = vrot.slane %v1249_v38, 2 }
 0x3a9   : > { %v1251_v40 = vmax.f32 %v1249_v38, %v1250_v39 }
 0x3ab   : > { %v1252_v41 = vrot.slane %v1251_v40, 1 }
 0x3ad   : > { %v1253_v42 = vmax.f32 %v1251_v40, %v1252_v41 }
 0x3af   : > { %v1254_v43 = vsub.f32 %v1246_v35, %v1253_v42 }
 0x3b1   : > { %v1255_v44 = vmul.f32 1.442695, %v1254_v43 }
 0x3b3   : > { %3547 = vpow2.f32 %v1255_v44 }
 0x3bd   : > { %v3548_v45 = vpop.eup %3547 }
 0x3be   : > { %v1257_v46 = vsel %vm1233_vm5, %v3548_v45, 0.0 }
 0x3bf   : > { %v1258_v47 = vrot.slane %v1257_v46, 4 }
 0x3c0   : > { %v2503_v48 = vpop.xlane.xlu1 %2502 }
 0x3c1   : > { %3549 = vlog2.f32 %v2503_v48  ;;  %v1259_v49 = vadd.f32 %v1258_v47, %v1257_v46 }
 0x3c3   : > { %v1260_v50 = vrot.slane %v1259_v49, 2 }
 0x3c5   : > { %v1261_v51 = vadd.f32 %v1260_v50, %v1259_v49 }
 0x3c7   : > { %v1262_v52 = vrot.slane %v1261_v51, 1 }
 0x3c9   : > { %v1263_v53 = vadd.f32 %v1262_v52, %v1261_v51 }
 0x3cb   : > { %v3550_v54 = vpop.eup %3549  ;;  %3551 = vlog2.f32 %v1263_v53 }
 0x3cc   : > { %v2505_v55 = vmul.f32 0.6931472, %v3550_v54 }
 0x3ce   : > { %v2506_v56 = vadd.f32 %v2505_v55, %v2497_v23 }
 0x3d0   : > { %v2507_v57 = vsub.f32 %v2494_v19, %v2506_v56 }
 0x3d2   : > { %v2508_v58 = vsel %vm1233_vm5, %v2507_v57, -inf }
 0x3d3   : > { %v2509_v59 = vrot.slane %v2508_v58, 4 }
 0x3d5   : > { %v3552_v60 = vpop.eup %3551  ;;  %v2510_v61 = vmax.f32 %v2508_v58, %v2509_v59 }
 0x3d6   : > { %v1265_v62 = vmul.f32 0.6931472, %v3552_v60 }
 0x3d7   : > { %v2511_v63 = vrot.slane %v2510_v61, 2 }
 0x3d8   : > { %v1266_v0 = vadd.f32 %v1265_v62, %v1253_v42 }
 0x3d9   : > { %v2512_v3 = vmax.f32 %v2510_v61, %v2511_v63 }
 0x3da   : > { %v1267_v4 = vsub.f32 %v1246_v35, %v1266_v0 }
 0x3db   : > { %v2513_v5 = vrot.slane %v2512_v3, 1 }
 0x3dc   : > { %v1268_v6 = vsel %vm1233_vm5, %v1267_v4, -inf }
 0x3dd   : > { %1269 = vmax.xlane.f32.xlu0 %v1268_v6  ;;  %v2514_v7 = vmax.f32 %v2512_v3, %v2513_v5 }
 0x3df   : > { %v2515_v8 = vsub.f32 %v2507_v57, %v2514_v7 }
 0x3e1   : > { %v2516_v9 = vmul.f32 1.442695, %v2515_v8 }
 0x3e3   : > { %3553 = vpow2.f32 %v2516_v9 }
 0x3ed   : > { %v3554_v10 = vpop.eup %3553 }
 0x3ee   : > { %v2518_v2 = vsel %vm1233_vm5, %v3554_v10, 0.0 }
 0x3ef   : > { %v2519_v1 = vrot.slane %v2518_v2, 4 }
 0x3f1   : > { %v2520_v11 = vadd.f32 %v2519_v1, %v2518_v2 }
 0x3f3   : > { %v2521_v12 = vrot.slane %v2520_v11, 2 }
 0x3f5   : > { %v2522_v13 = vadd.f32 %v2521_v12, %v2520_v11 }
 0x3f7   : > { %v2523_v14 = vrot.slane %v2522_v13, 1 }
 0x3f9   : > { %v2524_v15 = vadd.f32 %v2523_v14, %v2522_v13 }
 0x3fb   : > { %3555 = vlog2.f32 %v2524_v15 }
 0x405   : > { %v3556_v16 = vpop.eup %3555 }
 0x406   : > { %v2526_v17 = vmul.f32 0.6931472, %v3556_v16 }
 0x408   : > { %v2527_v18 = vadd.f32 %v2526_v17, %v2514_v7 }
 0x40a   : > { %v2528_v19 = vsub.f32 %v2507_v57, %v2527_v18 }
 0x40c   : > { %v2529_v20 = vsel %vm1233_vm5, %v2528_v19, -inf }
 0x40d   : > { %2530 = vmax.xlane.f32.xlu1 %v2529_v20 }
 0x46a   : > { %v1270_v21 = vpop.xlane.xlu0 %1269 }
 0x46b   : > { %v1271_v22 = vsub.f32 %v1267_v4, %v1270_v21 }
 0x46d   : > { %v1272_v24 = vmul.f32 1.442695, %v1271_v22 }
 0x46f   : > { %3557 = vpow2.f32 %v1272_v24 }
 0x479   : > { %v3558_v25 = vpop.eup %3557 }
 0x47a   : > { %v1274_v26 = vsel %vm1233_vm5, %v3558_v25, 0.0 }
 0x47b   : > { %1275 = vadd.xlane.f32.xlu0 %v1274_v26 }
 0x49a   : > { %v2531_v23 = vpop.xlane.xlu1 %2530 }
 0x49b   : > { %v2532_v27 = vsub.f32 %v2528_v19, %v2531_v23 }
 0x49d   : > { %v2533_v28 = vmul.f32 1.442695, %v2532_v27 }
 0x49f   : > { %3559 = vpow2.f32 %v2533_v28 }
 0x4a9   : > { %v3560_v29 = vpop.eup %3559 }
 0x4aa   : > { %v2535_v30 = vsel %vm1233_vm5, %v3560_v29, 0.0 }
 0x4ab   : > { %2536 = vadd.xlane.f32.xlu1 %v2535_v30 }
 0x508   : > { %v1276_v31 = vpop.xlane.xlu0 %1275 }
 0x509   : > { %3561 = vlog2.f32 %v1276_v31 }
 0x513   : > { %v3562_v32 = vpop.eup %3561 }
 0x514   : > { %v1278_v33 = vmul.f32 0.6931472, %v3562_v32 }
 0x516   : > { %v1279_v34 = vadd.f32 %v1278_v33, %v1270_v21 }
 0x518   : > { %v1280_v35 = vsub.f32 %v1267_v4, %v1279_v34 }
 0x51a   : > { %v1281_v36 = vsel %vm1233_vm5, %v1280_v35, -inf }
 0x51b   : > { %v1282_v37 = vrot.slane %v1281_v36, 4 }
 0x51d   : > { %v1283_v38 = vmax.f32 %v1281_v36, %v1282_v37 }
 0x51f   : > { %v1284_v39 = vrot.slane %v1283_v38, 2 }
 0x521   : > { %v1285_v40 = vmax.f32 %v1283_v38, %v1284_v39 }
 0x523   : > { %v1286_v41 = vrot.slane %v1285_v40, 1 }
 0x525   : > { %v1287_v42 = vmax.f32 %v1285_v40, %v1286_v41 }
 0x527   : > { %v1288_v43 = vsub.f32 %v1280_v35, %v1287_v42 }
 0x529   : > { %v1289_v44 = vmul.f32 1.442695, %v1288_v43 }
 0x52b   : > { %3563 = vpow2.f32 %v1289_v44 }
 0x535   : > { %v3564_v45 = vpop.eup %3563 }
 0x536   : > { %v1291_v46 = vsel %vm1233_vm5, %v3564_v45, 0.0 }
 0x537   : > { %v1292_v47 = vrot.slane %v1291_v46, 4 }
 0x538   : > { %v2537_v48 = vpop.xlane.xlu1 %2536 }
 0x539   : > { %3565 = vlog2.f32 %v2537_v48  ;;  %v1293_v49 = vadd.f32 %v1292_v47, %v1291_v46 }
 0x53b   : > { %v1294_v50 = vrot.slane %v1293_v49, 2 }
 0x53d   : > { %v1295_v51 = vadd.f32 %v1294_v50, %v1293_v49 }
 0x53f   : > { %v1296_v52 = vrot.slane %v1295_v51, 1 }
 0x541   : > { %v1297_v53 = vadd.f32 %v1296_v52, %v1295_v51 }
 0x543   : > { %v3566_v54 = vpop.eup %3565  ;;  %3567 = vlog2.f32 %v1297_v53 }
 0x544   : > { %v2539_v55 = vmul.f32 0.6931472, %v3566_v54 }
 0x546   : > { %v2540_v56 = vadd.f32 %v2539_v55, %v2531_v23 }
 0x548   : > { %v2541_v57 = vsub.f32 %v2528_v19, %v2540_v56 }
 0x54a   : > { %v2542_v58 = vsel %vm1233_vm5, %v2541_v57, -inf }
 0x54b   : > { %v2543_v59 = vrot.slane %v2542_v58, 4 }
 0x54d   : > { %v3568_v60 = vpop.eup %3567  ;;  %v2544_v61 = vmax.f32 %v2542_v58, %v2543_v59 }
 0x54e   : > { %v1299_v62 = vmul.f32 0.6931472, %v3568_v60 }
 0x54f   : > { %v2545_v63 = vrot.slane %v2544_v61, 2 }
 0x550   : > { %v1300_v0 = vadd.f32 %v1299_v62, %v1287_v42 }
 0x551   : > { %v2546_v3 = vmax.f32 %v2544_v61, %v2545_v63 }
 0x552   : > { %v1301_v4 = vsub.f32 %v1280_v35, %v1300_v0 }
 0x553   : > { %v2547_v5 = vrot.slane %v2546_v3, 1 }
 0x554   : > { %v1302_v6 = vsel %vm1233_vm5, %v1301_v4, -inf }
 0x555   : > { %1303 = vmax.xlane.f32.xlu0 %v1302_v6  ;;  %v2548_v7 = vmax.f32 %v2546_v3, %v2547_v5 }
 0x557   : > { %v2549_v8 = vsub.f32 %v2541_v57, %v2548_v7 }
 0x559   : > { %v2550_v9 = vmul.f32 1.442695, %v2549_v8 }
 0x55b   : > { %3569 = vpow2.f32 %v2550_v9 }
 0x565   : > { %v3570_v10 = vpop.eup %3569 }
 0x566   : > { %v2552_v2 = vsel %vm1233_vm5, %v3570_v10, 0.0 }
 0x567   : > { %v2553_v1 = vrot.slane %v2552_v2, 4 }
 0x569   : > { %v2554_v11 = vadd.f32 %v2553_v1, %v2552_v2 }
 0x56b   : > { %v2555_v12 = vrot.slane %v2554_v11, 2 }
 0x56d   : > { %v2556_v13 = vadd.f32 %v2555_v12, %v2554_v11 }
 0x56f   : > { %v2557_v14 = vrot.slane %v2556_v13, 1 }
 0x571   : > { %v2558_v15 = vadd.f32 %v2557_v14, %v2556_v13 }
 0x573   : > { %3571 = vlog2.f32 %v2558_v15 }
 0x57d   : > { %v3572_v16 = vpop.eup %3571 }
 0x57e   : > { %v2560_v17 = vmul.f32 0.6931472, %v3572_v16 }
 0x580   : > { %v2561_v18 = vadd.f32 %v2560_v17, %v2548_v7 }
 0x582   : > { %v2562_v19 = vsub.f32 %v2541_v57, %v2561_v18 }
 0x584   : > { %v2563_v20 = vsel %vm1233_vm5, %v2562_v19, -inf }
 0x585   : > { %2564 = vmax.xlane.f32.xlu1 %v2563_v20 }
 0x5e2   : > { %v1304_v21 = vpop.xlane.xlu0 %1303 }
 0x5e3   : > { %v1305_v22 = vsub.f32 %v1301_v4, %v1304_v21 }
 0x5e5   : > { %v1306_v24 = vmul.f32 1.442695, %v1305_v22 }
 0x5e7   : > { %3573 = vpow2.f32 %v1306_v24 }
 0x5f1   : > { %v3574_v25 = vpop.eup %3573 }
 0x5f2   : > { %v1308_v26 = vsel %vm1233_vm5, %v3574_v25, 0.0 }
 0x5f3   : > { %1309 = vadd.xlane.f32.xlu0 %v1308_v26 }
 0x612   : > { %v2565_v23 = vpop.xlane.xlu1 %2564 }
 0x613   : > { %v2566_v27 = vsub.f32 %v2562_v19, %v2565_v23 }
 0x615   : > { %v2567_v28 = vmul.f32 1.442695, %v2566_v27 }
 0x617   : > { %3575 = vpow2.f32 %v2567_v28 }
 0x621   : > { %v3576_v29 = vpop.eup %3575 }
 0x622   : > { %v2569_v30 = vsel %vm1233_vm5, %v3576_v29, 0.0 }
 0x623   : > { %2570 = vadd.xlane.f32.xlu1 %v2569_v30 }
 0x680   : > { %v1310_v31 = vpop.xlane.xlu0 %1309 }
 0x681   : > { %3577 = vlog2.f32 %v1310_v31 }
 0x68b   : > { %v3578_v32 = vpop.eup %3577 }
 0x68c   : > { %v1312_v33 = vmul.f32 0.6931472, %v3578_v32 }
 0x68e   : > { %v1313_v34 = vadd.f32 %v1312_v33, %v1304_v21 }
 0x690   : > { %v1314_v35 = vsub.f32 %v1301_v4, %v1313_v34 }
 0x692   : > { %v1315_v36 = vsel %vm1233_vm5, %v1314_v35, -inf }
 0x693   : > { %v1316_v37 = vrot.slane %v1315_v36, 4 }
 0x695   : > { %v1317_v38 = vmax.f32 %v1315_v36, %v1316_v37 }
 0x697   : > { %v1318_v39 = vrot.slane %v1317_v38, 2 }
 0x699   : > { %v1319_v40 = vmax.f32 %v1317_v38, %v1318_v39 }
 0x69b   : > { %v1320_v41 = vrot.slane %v1319_v40, 1 }
 0x69d   : > { %v1321_v42 = vmax.f32 %v1319_v40, %v1320_v41 }
 0x69f   : > { %v1322_v43 = vsub.f32 %v1314_v35, %v1321_v42 }
 0x6a1   : > { %v1323_v44 = vmul.f32 1.442695, %v1322_v43 }
 0x6a3   : > { %3579 = vpow2.f32 %v1323_v44 }
 0x6ad   : > { %v3580_v45 = vpop.eup %3579 }
 0x6ae   : > { %v1325_v46 = vsel %vm1233_vm5, %v3580_v45, 0.0 }
 0x6af   : > { %v1326_v47 = vrot.slane %v1325_v46, 4 }
 0x6b0   : > { %v2571_v48 = vpop.xlane.xlu1 %2570 }
 0x6b1   : > { %3581 = vlog2.f32 %v2571_v48  ;;  %v1327_v49 = vadd.f32 %v1326_v47, %v1325_v46 }
 0x6b3   : > { %v1328_v50 = vrot.slane %v1327_v49, 2 }
 0x6b5   : > { %v1329_v51 = vadd.f32 %v1328_v50, %v1327_v49 }
 0x6b7   : > { %v1330_v52 = vrot.slane %v1329_v51, 1 }
 0x6b9   : > { %v1331_v53 = vadd.f32 %v1330_v52, %v1329_v51 }
 0x6bb   : > { %v3582_v54 = vpop.eup %3581  ;;  %3583 = vlog2.f32 %v1331_v53 }
 0x6bc   : > { %v2573_v55 = vmul.f32 0.6931472, %v3582_v54 }
 0x6be   : > { %v2574_v56 = vadd.f32 %v2573_v55, %v2565_v23 }
 0x6c0   : > { %v2575_v57 = vsub.f32 %v2562_v19, %v2574_v56 }
 0x6c2   : > { %v2576_v58 = vsel %vm1233_vm5, %v2575_v57, -inf }
 0x6c3   : > { %v2577_v59 = vrot.slane %v2576_v58, 4 }
 0x6c5   : > { %v3584_v60 = vpop.eup %3583  ;;  %v2578_v61 = vmax.f32 %v2576_v58, %v2577_v59 }
 0x6c6   : > { %v1333_v62 = vmul.f32 0.6931472, %v3584_v60 }
 0x6c7   : > { %v2579_v63 = vrot.slane %v2578_v61, 2 }
 0x6c8   : > { %v1334_v0 = vadd.f32 %v1333_v62, %v1321_v42 }
 0x6c9   : > { %v2580_v3 = vmax.f32 %v2578_v61, %v2579_v63 }
 0x6ca   : > { %v1335_v4 = vsub.f32 %v1314_v35, %v1334_v0 }
 0x6cb   : > { %v2581_v5 = vrot.slane %v2580_v3, 1 }
 0x6cc   : > { %v1336_v6 = vsel %vm1233_vm5, %v1335_v4, -inf }
 0x6cd   : > { %1337 = vmax.xlane.f32.xlu0 %v1336_v6  ;;  %v2582_v7 = vmax.f32 %v2580_v3, %v2581_v5 }
 0x6cf   : > { %v2583_v8 = vsub.f32 %v2575_v57, %v2582_v7 }
 0x6d1   : > { %v2584_v9 = vmul.f32 1.442695, %v2583_v8 }
 0x6d3   : > { %3585 = vpow2.f32 %v2584_v9 }
 0x6dd   : > { %v3586_v10 = vpop.eup %3585 }
 0x6de   : > { %v2586_v2 = vsel %vm1233_vm5, %v3586_v10, 0.0 }
 0x6df   : > { %v2587_v1 = vrot.slane %v2586_v2, 4 }
 0x6e1   : > { %v2588_v11 = vadd.f32 %v2587_v1, %v2586_v2 }
 0x6e3   : > { %v2589_v12 = vrot.slane %v2588_v11, 2 }
 0x6e5   : > { %v2590_v13 = vadd.f32 %v2589_v12, %v2588_v11 }
 0x6e7   : > { %v2591_v14 = vrot.slane %v2590_v13, 1 }
 0x6e9   : > { %v2592_v15 = vadd.f32 %v2591_v14, %v2590_v13 }
 0x6eb   : > { %3587 = vlog2.f32 %v2592_v15 }
 0x6f5   : > { %v3588_v16 = vpop.eup %3587 }
 0x6f6   : > { %v2594_v17 = vmul.f32 0.6931472, %v3588_v16 }
 0x6f8   : > { %v2595_v18 = vadd.f32 %v2594_v17, %v2582_v7 }
 0x6fa   : > { %v2596_v19 = vsub.f32 %v2575_v57, %v2595_v18 }
 0x6fc   : > { %v2597_v20 = vsel %vm1233_vm5, %v2596_v19, -inf }
 0x6fd   : > { %2598 = vmax.xlane.f32.xlu1 %v2597_v20 }
 0x75a   : > { %v1338_v21 = vpop.xlane.xlu0 %1337 }
 0x75b   : > { %v1339_v22 = vsub.f32 %v1335_v4, %v1338_v21 }
 0x75d   : > { %v1340_v24 = vmul.f32 1.442695, %v1339_v22 }
 0x75f   : > { %3589 = vpow2.f32 %v1340_v24 }
 0x769   : > { %v3590_v25 = vpop.eup %3589 }
 0x76a   : > { %v1342_v26 = vsel %vm1233_vm5, %v3590_v25, 0.0 }
 0x76b   : > { %1343 = vadd.xlane.f32.xlu0 %v1342_v26 }
 0x78a   : > { %v2599_v23 = vpop.xlane.xlu1 %2598 }
 0x78b   : > { %v2600_v27 = vsub.f32 %v2596_v19, %v2599_v23 }
 0x78d   : > { %v2601_v28 = vmul.f32 1.442695, %v2600_v27 }
 0x78f   : > { %3591 = vpow2.f32 %v2601_v28 }
 0x799   : > { %v3592_v29 = vpop.eup %3591 }
 0x79a   : > { %v2603_v30 = vsel %vm1233_vm5, %v3592_v29, 0.0 }
 0x79b   : > { %2604 = vadd.xlane.f32.xlu1 %v2603_v30 }
 0x7f8   : > { %v1344_v31 = vpop.xlane.xlu0 %1343 }
 0x7f9   : > { %3593 = vlog2.f32 %v1344_v31 }
 0x803   : > { %v3594_v32 = vpop.eup %3593 }
 0x804   : > { %v1346_v33 = vmul.f32 0.6931472, %v3594_v32 }
 0x806   : > { %v1347_v34 = vadd.f32 %v1346_v33, %v1338_v21 }
 0x808   : > { %v1348_v35 = vsub.f32 %v1335_v4, %v1347_v34 }
 0x80a   : > { %v1349_v36 = vsel %vm1233_vm5, %v1348_v35, -inf }
 0x80b   : > { %v1350_v37 = vrot.slane %v1349_v36, 4 }
 0x80d   : > { %v1351_v38 = vmax.f32 %v1349_v36, %v1350_v37 }
 0x80f   : > { %v1352_v39 = vrot.slane %v1351_v38, 2 }
 0x811   : > { %v1353_v40 = vmax.f32 %v1351_v38, %v1352_v39 }
 0x813   : > { %v1354_v41 = vrot.slane %v1353_v40, 1 }
 0x815   : > { %v1355_v42 = vmax.f32 %v1353_v40, %v1354_v41 }
 0x817   : > { %v1356_v43 = vsub.f32 %v1348_v35, %v1355_v42 }
 0x819   : > { %v1357_v44 = vmul.f32 1.442695, %v1356_v43 }
 0x81b   : > { %3595 = vpow2.f32 %v1357_v44 }
 0x825   : > { %v3596_v45 = vpop.eup %3595 }
 0x826   : > { %v1359_v46 = vsel %vm1233_vm5, %v3596_v45, 0.0 }
 0x827   : > { %v1360_v47 = vrot.slane %v1359_v46, 4 }
 0x828   : > { %v2605_v48 = vpop.xlane.xlu1 %2604 }
 0x829   : > { %3597 = vlog2.f32 %v2605_v48  ;;  %v1361_v49 = vadd.f32 %v1360_v47, %v1359_v46 }
 0x82b   : > { %v1362_v50 = vrot.slane %v1361_v49, 2 }
 0x82d   : > { %v1363_v51 = vadd.f32 %v1362_v50, %v1361_v49 }
 0x82f   : > { %v1364_v52 = vrot.slane %v1363_v51, 1 }
 0x831   : > { %v1365_v53 = vadd.f32 %v1364_v52, %v1363_v51 }
 0x833   : > { %v3598_v54 = vpop.eup %3597  ;;  %3599 = vlog2.f32 %v1365_v53 }
 0x834   : > { %v2607_v55 = vmul.f32 0.6931472, %v3598_v54 }
 0x836   : > { %v2608_v56 = vadd.f32 %v2607_v55, %v2599_v23 }
 0x838   : > { %v2609_v57 = vsub.f32 %v2596_v19, %v2608_v56 }
 0x83a   : > { %v2610_v58 = vsel %vm1233_vm5, %v2609_v57, -inf }
 0x83b   : > { %v2611_v59 = vrot.slane %v2610_v58, 4 }
 0x83d   : > { %v3600_v60 = vpop.eup %3599  ;;  %v2612_v61 = vmax.f32 %v2610_v58, %v2611_v59 }
 0x83e   : > { %v1367_v62 = vmul.f32 0.6931472, %v3600_v60 }
 0x83f   : > { %v2613_v63 = vrot.slane %v2612_v61, 2 }
 0x840   : > { %v1368_v0 = vadd.f32 %v1367_v62, %v1355_v42 }
 0x841   : > { %v2614_v3 = vmax.f32 %v2612_v61, %v2613_v63 }
 0x842   : > { %v1369_v4 = vsub.f32 %v1348_v35, %v1368_v0 }
 0x843   : > { %v2615_v5 = vrot.slane %v2614_v3, 1 }
 0x844   : > { %v1370_v6 = vsel %vm1233_vm5, %v1369_v4, -inf }
 0x845   : > { %1371 = vmax.xlane.f32.xlu0 %v1370_v6  ;;  %v2616_v7 = vmax.f32 %v2614_v3, %v2615_v5 }
 0x847   : > { %v2617_v8 = vsub.f32 %v2609_v57, %v2616_v7 }
 0x849   : > { %v2618_v9 = vmul.f32 1.442695, %v2617_v8 }
 0x84b   : > { %3601 = vpow2.f32 %v2618_v9 }
 0x855   : > { %v3602_v10 = vpop.eup %3601 }
 0x856   : > { %v2620_v2 = vsel %vm1233_vm5, %v3602_v10, 0.0 }
 0x857   : > { %v2621_v1 = vrot.slane %v2620_v2, 4 }
 0x859   : > { %v2622_v11 = vadd.f32 %v2621_v1, %v2620_v2 }
 0x85b   : > { %v2623_v12 = vrot.slane %v2622_v11, 2 }
 0x85d   : > { %v2624_v13 = vadd.f32 %v2623_v12, %v2622_v11 }
 0x85f   : > { %v2625_v14 = vrot.slane %v2624_v13, 1 }
 0x861   : > { %v2626_v15 = vadd.f32 %v2625_v14, %v2624_v13 }
 0x863   : > { %3603 = vlog2.f32 %v2626_v15 }
 0x86d   : > { %v3604_v16 = vpop.eup %3603 }
 0x86e   : > { %v2628_v17 = vmul.f32 0.6931472, %v3604_v16 }
 0x870   : > { %v2629_v18 = vadd.f32 %v2628_v17, %v2616_v7 }
 0x872   : > { %v2630_v19 = vsub.f32 %v2609_v57, %v2629_v18 }
 0x874   : > { %v2631_v20 = vsel %vm1233_vm5, %v2630_v19, -inf }
 0x875   : > { %2632 = vmax.xlane.f32.xlu1 %v2631_v20 }
 0x8d2   : > { %v1372_v21 = vpop.xlane.xlu0 %1371 }
 0x8d3   : > { %v1373_v22 = vsub.f32 %v1369_v4, %v1372_v21 }
 0x8d5   : > { %v1374_v24 = vmul.f32 1.442695, %v1373_v22 }
 0x8d7   : > { %3605 = vpow2.f32 %v1374_v24 }
 0x8e1   : > { %v3606_v25 = vpop.eup %3605 }
 0x8e2   : > { %v1376_v26 = vsel %vm1233_vm5, %v3606_v25, 0.0 }
 0x8e3   : > { %1377 = vadd.xlane.f32.xlu0 %v1376_v26 }
 0x902   : > { %v2633_v23 = vpop.xlane.xlu1 %2632 }
 0x903   : > { %v2634_v27 = vsub.f32 %v2630_v19, %v2633_v23 }
 0x905   : > { %v2635_v28 = vmul.f32 1.442695, %v2634_v27 }
 0x907   : > { %3607 = vpow2.f32 %v2635_v28 }
 0x911   : > { %v3608_v29 = vpop.eup %3607 }
 0x912   : > { %v2637_v30 = vsel %vm1233_vm5, %v3608_v29, 0.0 }
 0x913   : > { %2638 = vadd.xlane.f32.xlu1 %v2637_v30 }
 0x970   : > { %v1378_v31 = vpop.xlane.xlu0 %1377 }
 0x971   : > { %3609 = vlog2.f32 %v1378_v31 }
 0x97b   : > { %v3610_v32 = vpop.eup %3609 }
 0x97c   : > { %v1380_v33 = vmul.f32 0.6931472, %v3610_v32 }
 0x97e   : > { %v1381_v34 = vadd.f32 %v1380_v33, %v1372_v21 }
 0x980   : > { %v1382_v35 = vsub.f32 %v1369_v4, %v1381_v34 }
 0x982   : > { %v1383_v36 = vsel %vm1233_vm5, %v1382_v35, -inf }
 0x983   : > { %v1384_v37 = vrot.slane %v1383_v36, 4 }
 0x985   : > { %v1385_v38 = vmax.f32 %v1383_v36, %v1384_v37 }
 0x987   : > { %v1386_v39 = vrot.slane %v1385_v38, 2 }
 0x989   : > { %v1387_v40 = vmax.f32 %v1385_v38, %v1386_v39 }
 0x98b   : > { %v1388_v41 = vrot.slane %v1387_v40, 1 }
 0x98d   : > { %v1389_v42 = vmax.f32 %v1387_v40, %v1388_v41 }
 0x98f   : > { %v1390_v43 = vsub.f32 %v1382_v35, %v1389_v42 }
 0x991   : > { %v1391_v44 = vmul.f32 1.442695, %v1390_v43 }
 0x993   : > { %3611 = vpow2.f32 %v1391_v44 }
 0x99d   : > { %v3612_v45 = vpop.eup %3611 }
 0x99e   : > { %v1393_v46 = vsel %vm1233_vm5, %v3612_v45, 0.0 }
 0x99f   : > { %v1394_v47 = vrot.slane %v1393_v46, 4 }
 0x9a0   : > { %v2639_v48 = vpop.xlane.xlu1 %2638 }
 0x9a1   : > { %3613 = vlog2.f32 %v2639_v48  ;;  %v1395_v49 = vadd.f32 %v1394_v47, %v1393_v46 }
 0x9a3   : > { %v1396_v50 = vrot.slane %v1395_v49, 2 }
 0x9a5   : > { %v1397_v51 = vadd.f32 %v1396_v50, %v1395_v49 }
 0x9a7   : > { %v1398_v52 = vrot.slane %v1397_v51, 1 }
 0x9a9   : > { %v1399_v53 = vadd.f32 %v1398_v52, %v1397_v51 }
 0x9ab   : > { %v3614_v54 = vpop.eup %3613  ;;  %3615 = vlog2.f32 %v1399_v53 }
 0x9ac   : > { %v2641_v55 = vmul.f32 0.6931472, %v3614_v54 }
 0x9ae   : > { %v2642_v56 = vadd.f32 %v2641_v55, %v2633_v23 }
 0x9b0   : > { %v2643_v57 = vsub.f32 %v2630_v19, %v2642_v56 }
 0x9b2   : > { %v2644_v58 = vsel %vm1233_vm5, %v2643_v57, -inf }
 0x9b3   : > { %v2645_v59 = vrot.slane %v2644_v58, 4 }
 0x9b5   : > { %v3616_v60 = vpop.eup %3615  ;;  %v2646_v61 = vmax.f32 %v2644_v58, %v2645_v59 }
 0x9b6   : > { %v1401_v62 = vmul.f32 0.6931472, %v3616_v60 }
 0x9b7   : > { %v2647_v63 = vrot.slane %v2646_v61, 2 }
 0x9b8   : > { %v1402_v0 = vadd.f32 %v1401_v62, %v1389_v42 }
 0x9b9   : > { %v2648_v3 = vmax.f32 %v2646_v61, %v2647_v63 }
 0x9ba   : > { %v1403_v4 = vsub.f32 %v1382_v35, %v1402_v0 }
 0x9bb   : > { %v2649_v5 = vrot.slane %v2648_v3, 1 }
 0x9bc   : > { %v1404_v6 = vsel %vm1233_vm5, %v1403_v4, -inf }
 0x9bd   : > { %1405 = vmax.xlane.f32.xlu0 %v1404_v6  ;;  %v2650_v7 = vmax.f32 %v2648_v3, %v2649_v5 }
 0x9bf   : > { %v2651_v8 = vsub.f32 %v2643_v57, %v2650_v7 }
 0x9c1   : > { %v2652_v9 = vmul.f32 1.442695, %v2651_v8 }
 0x9c3   : > { %3617 = vpow2.f32 %v2652_v9 }
 0x9cd   : > { %v3618_v10 = vpop.eup %3617 }
 0x9ce   : > { %v2654_v2 = vsel %vm1233_vm5, %v3618_v10, 0.0 }
 0x9cf   : > { %v2655_v1 = vrot.slane %v2654_v2, 4 }
 0x9d1   : > { %v2656_v11 = vadd.f32 %v2655_v1, %v2654_v2 }
 0x9d3   : > { %v2657_v12 = vrot.slane %v2656_v11, 2 }
 0x9d5   : > { %v2658_v13 = vadd.f32 %v2657_v12, %v2656_v11 }
 0x9d7   : > { %v2659_v14 = vrot.slane %v2658_v13, 1 }
 0x9d9   : > { %v2660_v15 = vadd.f32 %v2659_v14, %v2658_v13 }
 0x9db   : > { %3619 = vlog2.f32 %v2660_v15 }
 0x9e5   : > { %v3620_v16 = vpop.eup %3619 }
 0x9e6   : > { %v2662_v17 = vmul.f32 0.6931472, %v3620_v16 }
 0x9e8   : > { %v2663_v18 = vadd.f32 %v2662_v17, %v2650_v7 }
 0x9ea   : > { %v2664_v19 = vsub.f32 %v2643_v57, %v2663_v18 }
 0x9ec   : > { %v2665_v20 = vsel %vm1233_vm5, %v2664_v19, -inf }
 0x9ed   : > { %2666 = vmax.xlane.f32.xlu1 %v2665_v20 }
 0xa4a   : > { %v1406_v21 = vpop.xlane.xlu0 %1405 }
 0xa4b   : > { %v1407_v22 = vsub.f32 %v1403_v4, %v1406_v21 }
 0xa4d   : > { %v1408_v24 = vmul.f32 1.442695, %v1407_v22 }
 0xa4f   : > { %3621 = vpow2.f32 %v1408_v24 }
 0xa59   : > { %v3622_v25 = vpop.eup %3621 }
 0xa5a   : > { %v1410_v26 = vsel %vm1233_vm5, %v3622_v25, 0.0 }
 0xa5b   : > { %1411 = vadd.xlane.f32.xlu0 %v1410_v26 }
 0xa7a   : > { %v2667_v23 = vpop.xlane.xlu1 %2666 }
 0xa7b   : > { %v2668_v27 = vsub.f32 %v2664_v19, %v2667_v23 }
 0xa7d   : > { %v2669_v28 = vmul.f32 1.442695, %v2668_v27 }
 0xa7f   : > { %3623 = vpow2.f32 %v2669_v28 }
 0xa89   : > { %v3624_v29 = vpop.eup %3623 }
 0xa8a   : > { %v2671_v30 = vsel %vm1233_vm5, %v3624_v29, 0.0 }
 0xa8b   : > { %2672 = vadd.xlane.f32.xlu1 %v2671_v30 }
 0xae8   : > { %v1412_v31 = vpop.xlane.xlu0 %1411 }
 0xae9   : > { %3625 = vlog2.f32 %v1412_v31 }
 0xaf3   : > { %v3626_v32 = vpop.eup %3625 }
 0xaf4   : > { %v1414_v33 = vmul.f32 0.6931472, %v3626_v32 }
 0xaf6   : > { %v1415_v34 = vadd.f32 %v1414_v33, %v1406_v21 }
 0xaf8   : > { %v1416_v35 = vsub.f32 %v1403_v4, %v1415_v34 }
 0xafa   : > { %v1417_v36 = vsel %vm1233_vm5, %v1416_v35, -inf }
 0xafb   : > { %v1418_v37 = vrot.slane %v1417_v36, 4 }
 0xafd   : > { %v1419_v38 = vmax.f32 %v1417_v36, %v1418_v37 }
 0xaff   : > { %v1420_v39 = vrot.slane %v1419_v38, 2 }
 0xb01   : > { %v1421_v40 = vmax.f32 %v1419_v38, %v1420_v39 }
 0xb03   : > { %v1422_v41 = vrot.slane %v1421_v40, 1 }
 0xb05   : > { %v1423_v42 = vmax.f32 %v1421_v40, %v1422_v41 }
 0xb07   : > { %v1424_v43 = vsub.f32 %v1416_v35, %v1423_v42 }
 0xb09   : > { %v1425_v44 = vmul.f32 1.442695, %v1424_v43 }
 0xb0b   : > { %3627 = vpow2.f32 %v1425_v44 }
 0xb15   : > { %v3628_v45 = vpop.eup %3627 }
 0xb16   : > { %v1427_v46 = vsel %vm1233_vm5, %v3628_v45, 0.0 }
 0xb17   : > { %v1428_v47 = vrot.slane %v1427_v46, 4 }
 0xb18   : > { %v2673_v48 = vpop.xlane.xlu1 %2672 }
 0xb19   : > { %3629 = vlog2.f32 %v2673_v48  ;;  %v1429_v49 = vadd.f32 %v1428_v47, %v1427_v46 }
 0xb1b   : > { %v1430_v50 = vrot.slane %v1429_v49, 2 }
 0xb1d   : > { %v1431_v51 = vadd.f32 %v1430_v50, %v1429_v49 }
 0xb1f   : > { %v1432_v52 = vrot.slane %v1431_v51, 1 }
 0xb21   : > { %v1433_v53 = vadd.f32 %v1432_v52, %v1431_v51 }
 0xb23   : > { %v3630_v54 = vpop.eup %3629  ;;  %3631 = vlog2.f32 %v1433_v53 }
 0xb24   : > { %v2675_v55 = vmul.f32 0.6931472, %v3630_v54 }
 0xb26   : > { %v2676_v56 = vadd.f32 %v2675_v55, %v2667_v23 }
 0xb28   : > { %v2677_v57 = vsub.f32 %v2664_v19, %v2676_v56 }
 0xb2a   : > { %v2678_v58 = vsel %vm1233_vm5, %v2677_v57, -inf }
 0xb2b   : > { %v2679_v59 = vrot.slane %v2678_v58, 4 }
 0xb2d   : > { %v3632_v60 = vpop.eup %3631  ;;  %v2680_v61 = vmax.f32 %v2678_v58, %v2679_v59 }
 0xb2e   : > { %v1435_v62 = vmul.f32 0.6931472, %v3632_v60 }
 0xb2f   : > { %v2681_v63 = vrot.slane %v2680_v61, 2 }
 0xb30   : > { %v1436_v0 = vadd.f32 %v1435_v62, %v1423_v42 }
 0xb31   : > { %v2682_v3 = vmax.f32 %v2680_v61, %v2681_v63 }
 0xb32   : > { %v1437_v4 = vsub.f32 %v1416_v35, %v1436_v0 }
 0xb33   : > { %v2683_v5 = vrot.slane %v2682_v3, 1 }
 0xb34   : > { %v1438_v6 = vsel %vm1233_vm5, %v1437_v4, -inf }
 0xb35   : > { %1439 = vmax.xlane.f32.xlu0 %v1438_v6  ;;  %v2684_v7 = vmax.f32 %v2682_v3, %v2683_v5 }
 0xb37   : > { %v2685_v8 = vsub.f32 %v2677_v57, %v2684_v7 }
 0xb39   : > { %v2686_v9 = vmul.f32 1.442695, %v2685_v8 }
 0xb3b   : > { %3633 = vpow2.f32 %v2686_v9 }
 0xb45   : > { %v3634_v10 = vpop.eup %3633 }
 0xb46   : > { %v2688_v2 = vsel %vm1233_vm5, %v3634_v10, 0.0 }
 0xb47   : > { %v2689_v1 = vrot.slane %v2688_v2, 4 }
 0xb49   : > { %v2690_v11 = vadd.f32 %v2689_v1, %v2688_v2 }
 0xb4b   : > { %v2691_v12 = vrot.slane %v2690_v11, 2 }
 0xb4d   : > { %v2692_v13 = vadd.f32 %v2691_v12, %v2690_v11 }
 0xb4f   : > { %v2693_v14 = vrot.slane %v2692_v13, 1 }
 0xb51   : > { %v2694_v15 = vadd.f32 %v2693_v14, %v2692_v13 }
 0xb53   : > { %3635 = vlog2.f32 %v2694_v15 }
 0xb5d   : > { %v3636_v16 = vpop.eup %3635 }
 0xb5e   : > { %v2696_v17 = vmul.f32 0.6931472, %v3636_v16 }
 0xb60   : > { %v2697_v18 = vadd.f32 %v2696_v17, %v2684_v7 }
 0xb62   : > { %v2698_v19 = vsub.f32 %v2677_v57, %v2697_v18 }
 0xb64   : > { %v2699_v20 = vsel %vm1233_vm5, %v2698_v19, -inf }
 0xb65   : > { %2700 = vmax.xlane.f32.xlu1 %v2699_v20 }
 0xbc2   : > { %v1440_v21 = vpop.xlane.xlu0 %1439 }
 0xbc3   : > { %v1441_v22 = vsub.f32 %v1437_v4, %v1440_v21 }
 0xbc5   : > { %v1442_v24 = vmul.f32 1.442695, %v1441_v22 }
 0xbc7   : > { %3637 = vpow2.f32 %v1442_v24 }
 0xbd1   : > { %v3638_v25 = vpop.eup %3637 }
 0xbd2   : > { %v1444_v26 = vsel %vm1233_vm5, %v3638_v25, 0.0 }
 0xbd3   : > { %1445 = vadd.xlane.f32.xlu0 %v1444_v26 }
 0xbf2   : > { %v2701_v23 = vpop.xlane.xlu1 %2700 }
 0xbf3   : > { %v2702_v27 = vsub.f32 %v2698_v19, %v2701_v23 }
 0xbf5   : > { %v2703_v28 = vmul.f32 1.442695, %v2702_v27 }
 0xbf7   : > { %3639 = vpow2.f32 %v2703_v28 }
 0xc01   : > { %v3640_v29 = vpop.eup %3639 }
 0xc02   : > { %v2705_v30 = vsel %vm1233_vm5, %v3640_v29, 0.0 }
 0xc03   : > { %2706 = vadd.xlane.f32.xlu1 %v2705_v30 }
 0xc60   : > { %v1446_v31 = vpop.xlane.xlu0 %1445 }
 0xc61   : > { %3641 = vlog2.f32 %v1446_v31 }
 0xc6b   : > { %v3642_v32 = vpop.eup %3641 }
 0xc6c   : > { %v1448_v33 = vmul.f32 0.6931472, %v3642_v32 }
 0xc6e   : > { %v1449_v34 = vadd.f32 %v1448_v33, %v1440_v21 }
 0xc70   : > { %v1450_v35 = vsub.f32 %v1437_v4, %v1449_v34 }
 0xc72   : > { %v1451_v36 = vsel %vm1233_vm5, %v1450_v35, -inf }
 0xc73   : > { %v1452_v37 = vrot.slane %v1451_v36, 4 }
 0xc75   : > { %v1453_v38 = vmax.f32 %v1451_v36, %v1452_v37 }
 0xc77   : > { %v1454_v39 = vrot.slane %v1453_v38, 2 }
 0xc79   : > { %v1455_v40 = vmax.f32 %v1453_v38, %v1454_v39 }
 0xc7b   : > { %v1456_v41 = vrot.slane %v1455_v40, 1 }
 0xc7d   : > { %v1457_v42 = vmax.f32 %v1455_v40, %v1456_v41 }
 0xc7f   : > { %v1458_v43 = vsub.f32 %v1450_v35, %v1457_v42 }
 0xc81   : > { %v1459_v44 = vmul.f32 1.442695, %v1458_v43 }
 0xc83   : > { %3643 = vpow2.f32 %v1459_v44 }
 0xc8d   : > { %v3644_v45 = vpop.eup %3643 }
 0xc8e   : > { %v1461_v46 = vsel %vm1233_vm5, %v3644_v45, 0.0 }
 0xc8f   : > { %v1462_v47 = vrot.slane %v1461_v46, 4 }
 0xc90   : > { %v2707_v48 = vpop.xlane.xlu1 %2706 }
 0xc91   : > { %3645 = vlog2.f32 %v2707_v48  ;;  %v1463_v49 = vadd.f32 %v1462_v47, %v1461_v46 }
 0xc93   : > { %v1464_v50 = vrot.slane %v1463_v49, 2 }
 0xc95   : > { %v1465_v51 = vadd.f32 %v1464_v50, %v1463_v49 }
 0xc97   : > { %v1466_v52 = vrot.slane %v1465_v51, 1 }
 0xc99   : > { %v1467_v53 = vadd.f32 %v1466_v52, %v1465_v51 }
 0xc9b   : > { %v3646_v54 = vpop.eup %3645  ;;  %3647 = vlog2.f32 %v1467_v53 }
 0xc9c   : > { %v2709_v55 = vmul.f32 0.6931472, %v3646_v54 }
 0xc9e   : > { %v2710_v56 = vadd.f32 %v2709_v55, %v2701_v23 }
 0xca0   : > { %v2711_v57 = vsub.f32 %v2698_v19, %v2710_v56 }
 0xca2   : > { %v2712_v58 = vsel %vm1233_vm5, %v2711_v57, -inf }
 0xca3   : > { %v2713_v59 = vrot.slane %v2712_v58, 4 }
 0xca5   : > { %v3648_v60 = vpop.eup %3647  ;;  %v2714_v61 = vmax.f32 %v2712_v58, %v2713_v59 }
 0xca6   : > { %v1469_v62 = vmul.f32 0.6931472, %v3648_v60 }
 0xca7   : > { %v2715_v63 = vrot.slane %v2714_v61, 2 }
 0xca8   : > { %v1470_v0 = vadd.f32 %v1469_v62, %v1457_v42 }
 0xca9   : > { %v2716_v3 = vmax.f32 %v2714_v61, %v2715_v63 }
 0xcaa   : > { %v1471_v4 = vsub.f32 %v1450_v35, %v1470_v0 }
 0xcab   : > { %v2717_v5 = vrot.slane %v2716_v3, 1 }
 0xcac   : > { %v1472_v6 = vsel %vm1233_vm5, %v1471_v4, -inf }
 0xcad   : > { %1473 = vmax.xlane.f32.xlu0 %v1472_v6  ;;  %v2718_v7 = vmax.f32 %v2716_v3, %v2717_v5 }
 0xcaf   : > { %v2719_v8 = vsub.f32 %v2711_v57, %v2718_v7 }
 0xcb1   : > { %v2720_v9 = vmul.f32 1.442695, %v2719_v8 }
 0xcb3   : > { %3649 = vpow2.f32 %v2720_v9 }
 0xcbd   : > { %v3650_v10 = vpop.eup %3649 }
 0xcbe   : > { %v2722_v2 = vsel %vm1233_vm5, %v3650_v10, 0.0 }
 0xcbf   : > { %v2723_v1 = vrot.slane %v2722_v2, 4 }
 0xcc1   : > { %v2724_v11 = vadd.f32 %v2723_v1, %v2722_v2 }
 0xcc3   : > { %v2725_v12 = vrot.slane %v2724_v11, 2 }
 0xcc5   : > { %v2726_v13 = vadd.f32 %v2725_v12, %v2724_v11 }
 0xcc7   : > { %v2727_v14 = vrot.slane %v2726_v13, 1 }
 0xcc9   : > { %v2728_v15 = vadd.f32 %v2727_v14, %v2726_v13 }
 0xccb   : > { %3651 = vlog2.f32 %v2728_v15 }
 0xcd5   : > { %v3652_v16 = vpop.eup %3651 }
 0xcd6   : > { %v2730_v17 = vmul.f32 0.6931472, %v3652_v16 }
 0xcd8   : > { %v2731_v18 = vadd.f32 %v2730_v17, %v2718_v7 }
 0xcda   : > { %v2732_v19 = vsub.f32 %v2711_v57, %v2731_v18 }
 0xcdc   : > { %v2733_v20 = vsel %vm1233_vm5, %v2732_v19, -inf }
 0xcdd   : > { %2734 = vmax.xlane.f32.xlu1 %v2733_v20 }
 0xd3a   : > { %v1474_v21 = vpop.xlane.xlu0 %1473 }
 0xd3b   : > { %v1475_v22 = vsub.f32 %v1471_v4, %v1474_v21 }
 0xd3d   : > { %v1476_v24 = vmul.f32 1.442695, %v1475_v22 }
 0xd3f   : > { %3653 = vpow2.f32 %v1476_v24 }
 0xd49   : > { %v3654_v25 = vpop.eup %3653 }
 0xd4a   : > { %v1478_v26 = vsel %vm1233_vm5, %v3654_v25, 0.0 }
 0xd4b   : > { %1479 = vadd.xlane.f32.xlu0 %v1478_v26 }
 0xd6a   : > { %v2735_v23 = vpop.xlane.xlu1 %2734 }
 0xd6b   : > { %v2736_v27 = vsub.f32 %v2732_v19, %v2735_v23 }
 0xd6d   : > { %v2737_v28 = vmul.f32 1.442695, %v2736_v27 }
 0xd6f   : > { %3655 = vpow2.f32 %v2737_v28 }
 0xd79   : > { %v3656_v29 = vpop.eup %3655 }
 0xd7a   : > { %v2739_v30 = vsel %vm1233_vm5, %v3656_v29, 0.0 }
 0xd7b   : > { %2740 = vadd.xlane.f32.xlu1 %v2739_v30 }
 0xdd8   : > { %v1480_v31 = vpop.xlane.xlu0 %1479 }
 0xdd9   : > { %3657 = vlog2.f32 %v1480_v31 }
 0xde3   : > { %v3658_v32 = vpop.eup %3657 }
 0xde4   : > { %v1482_v33 = vmul.f32 0.6931472, %v3658_v32 }
 0xde6   : > { %v1483_v34 = vadd.f32 %v1482_v33, %v1474_v21 }
 0xde8   : > { %v1484_v35 = vsub.f32 %v1471_v4, %v1483_v34 }
 0xdea   : > { %v1485_v36 = vsel %vm1233_vm5, %v1484_v35, -inf }
 0xdeb   : > { %v1486_v37 = vrot.slane %v1485_v36, 4 }
 0xded   : > { %v1487_v38 = vmax.f32 %v1485_v36, %v1486_v37 }
 0xdef   : > { %v1488_v39 = vrot.slane %v1487_v38, 2 }
 0xdf1   : > { %v1489_v40 = vmax.f32 %v1487_v38, %v1488_v39 }
 0xdf3   : > { %v1490_v41 = vrot.slane %v1489_v40, 1 }
 0xdf5   : > { %v1491_v42 = vmax.f32 %v1489_v40, %v1490_v41 }
 0xdf7   : > { %v1492_v43 = vsub.f32 %v1484_v35, %v1491_v42 }
 0xdf9   : > { %v1493_v44 = vmul.f32 1.442695, %v1492_v43 }
 0xdfb   : > { %3659 = vpow2.f32 %v1493_v44 }
 0xe05   : > { %v3660_v45 = vpop.eup %3659 }
 0xe06   : > { %v1495_v46 = vsel %vm1233_vm5, %v3660_v45, 0.0 }
 0xe07   : > { %v1496_v47 = vrot.slane %v1495_v46, 4 }
 0xe08   : > { %v2741_v48 = vpop.xlane.xlu1 %2740 }
 0xe09   : > { %v1497_v49 = vadd.f32 %v1496_v47, %v1495_v46  ;;  %3661 = vlog2.f32 %v2741_v48 }
 0xe0b   : > { %v1498_v50 = vrot.slane %v1497_v49, 2 }
 0xe0d   : > { %v1499_v51 = vadd.f32 %v1498_v50, %v1497_v49 }
 0xe0f   : > { %v1500_v52 = vrot.slane %v1499_v51, 1 }
 0xe11   : > { %v1501_v53 = vadd.f32 %v1500_v52, %v1499_v51 }
 0xe13   : > { %v3662_v54 = vpop.eup %3661  ;;  %3663 = vlog2.f32 %v1501_v53 }
 0xe14   : > { %v2743_v55 = vmul.f32 0.6931472, %v3662_v54 }
 0xe16   : > { %v2744_v56 = vadd.f32 %v2743_v55, %v2735_v23 }
 0xe18   : > { %v2745_v57 = vsub.f32 %v2732_v19, %v2744_v56 }
 0xe1a   : > { %v2746_v58 = vsel %vm1233_vm5, %v2745_v57, -inf }
 0xe1b   : > { %v2747_v59 = vrot.slane %v2746_v58, 4 }
 0xe1d   : > { %v3664_v60 = vpop.eup %3663  ;;  %v2748_v61 = vmax.f32 %v2746_v58, %v2747_v59 }
 0xe1e   : > { %v1503_v62 = vmul.f32 0.6931472, %v3664_v60 }
 0xe1f   : > { %v2749_v63 = vrot.slane %v2748_v61, 2 }
 0xe20   : > { %v1504_v0 = vadd.f32 %v1503_v62, %v1491_v42 }
 0xe21   : > { %v2750_v3 = vmax.f32 %v2748_v61, %v2749_v63 }
 0xe22   : > { %v1505_v4 = vsub.f32 %v1484_v35, %v1504_v0 }
 0xe23   : > { %v2751_v5 = vrot.slane %v2750_v3, 1 }
 0xe24   : > { %v1506_v6 = vmul.f32 1.442695, %v1505_v4 }
 0xe25   : > { %v2752_v7 = vmax.f32 %v2750_v3, %v2751_v5 }
 0xe26   : > { %3665 = vpow2.f32 %v1506_v6 }
 0xe27   : > { %v2753_v8 = vsub.f32 %v2745_v57, %v2752_v7 }
 0xe29   : > { %v2754_v9 = vmul.f32 1.442695, %v2753_v8 }
 0xe2b   : > { %3667 = vpow2.f32 %v2754_v9 }
 0xe30   : > { %v3666_v10 = vpop.eup %3665 }
 0xe31   : > { %1508 = vst.msk [vmem:[%s218_s27] sm:$0xff] %vm1233_vm5, %v3666_v10 }
 0xe35   : > { %v3668_v2 = vpop.eup %3667 }
 0xe36   : > { %v2756_v1 = vsel %vm1233_vm5, %v3668_v2, 0.0 }
 0xe37   : > { %v2757_v11 = vrot.slane %v2756_v1, 4 }
 0xe39   : > { %v2758_v12 = vadd.f32 %v2757_v11, %v2756_v1 }
 0xe3b   : > { %v2759_v13 = vrot.slane %v2758_v12, 2 }
 0xe3d   : > { %v2760_v14 = vadd.f32 %v2759_v13, %v2758_v12 }
 0xe3f   : > { %v2761_v15 = vrot.slane %v2760_v14, 1 }
 0xe41   : > { %v2762_v16 = vadd.f32 %v2761_v15, %v2760_v14 }
 0xe43   : > { %3669 = vlog2.f32 %v2762_v16 }
 0xe4d   : > { %v3670_v17 = vpop.eup %3669 }
 0xe4e   : > { %v2764_v18 = vmul.f32 0.6931472, %v3670_v17 }
 0xe50   : > { %v2765_v19 = vadd.f32 %v2764_v18, %v2752_v7 }
 0xe52   : > { %v2766_v20 = vsub.f32 %v2745_v57, %v2765_v19 }
 0xe54   : > { %v2767_v21 = vmul.f32 1.442695, %v2766_v20 }
 0xe56   : > { %3671 = vpow2.f32 %v2767_v21 }
 0xe60   : > { %v3672_v22 = vpop.eup %3671 }
 0xe61   : > { %2906 = vst.msk [vmem:[%s218_s27 + $0x8] sm:$0xff] %vm1233_vm5, %v3672_v22 }
 0xe62   : > { %3716 = shalt.err (!%p3713_p3)
}
 0xe63   : > { %s3717_s7 = scalar_lea.hbm %s4177_s10, 256  ;;  %s3721_s19 = scalar_lea.hbm %s4226_s3, 1024 }
 0xe64   : > { %p3718_p4 = scmp.ne.s32.totalorder %s4177_s10, %s3717_s7  ;;  %p3722_p2 = scmp.lt.u32.totalorder %s4177_s10, %s4226_s3 }
 0xe65   : > { %p3723_p7 = scmp.lt.u32.totalorder %s3721_s19, %s3717_s7  ;;  %p3725_p10 = scmp.lt.u32.totalorder %s3717_s7, %s4177_s10 }
 0xe66   : > { %p3719_p5 = pnand %p3718_p4, %p4235_p11 }
 0xe67   : > { %p3724_p6 = por %p3723_p7, %p3722_p2 }
 0xe68   : > { %p3720_p0 = pneg %p3719_p5 }
 0xe69   : > { %p3726_p12 = por %p3725_p10, %p3724_p6 }
 0xe6b   : > { %p3727_p8 = pnand %p3726_p12, %p3720_p0 }
 0xe6d   : > { %3730 = shalt.err (!%p3727_p8)
}
 0xe6e   : > { %s3778_s26 = smov 128   ;;  %s3779_s27 = smov 8  }
 0xe6f   : > { %3486 = dma.vmem_to_hbm [thread:$0]  (%p4235_p11), %s4179_s29, 256, %s4177_s10, %s2772_s11, %s3778_s26, %s3778_s26, %s3779_s27  }
 0xe70 PF: > { %p3497_p9 = scmp.ge.s32.totalorder %s3769_s15, 2  ;;  %s2800_s28 = sand.u32 1, %s3757_s12  }
 0xe71   : > { %p4236_p13 = scmp.ne.s32.totalorder %s4231_s25, 0  ;;  %s2801_s30 = scalar_lea.sflag [#allocation4], %s2800_s28 }
 0xe73   : > { %p3493_p1 = pnand %p3497_p9, %p4236_p13 }
 0xe75   : > { %3752 = dma.done.wait (!%p3493_p1), %s2801_s30, 256  }
 0xe76   : > { %3754 = vsyncadd (!%p3493_p1), %s2801_s30, 4294967040  ;;  %p16_p3 = scmp.ge.s32.totalorder %s3825_s18, 6   ;;  %s4237_s12 = smov %s3761_s13 }
 0xe77   : > { %s4238_s13 = smov %s3765_s14  ;;  %s4239_s14 = smov %s3837_s21 }
 0xe78   : > { %s4240_s15 = smov %s3825_s18  ;;  %18 = sbr.rel (!%p16_p3) target bundleno = 5 (0x5), region = 86 }
 0xe7f   :  { %2806 = vsyncpa [#allocation3], 1 }
 0xe80   :  { %2808 = vsyncpa [#allocation3 + $0x1], 1 }
 0xe81   :  { %2809 = vsyncpa [#allocation4], 1 }
 0xe82   :  { %2811 = vsyncpa [#allocation4 + $0x1], 1 }

</bundles_post_ra>
